<compile_context>
chip_gen: v5e
topology: v5e:2x2
jax: 0.10.0
libtpu: 0.0.40
codegen_flags: <defaults>
</compile_context>

<pallas_src>
import jax
import jax.numpy as jnp
from jax import lax
from jax.experimental import pallas as pl
from jax.experimental.pallas import tpu as pltpu


def prompt_learner_v4_forward(tokenized_prompts, token_embedding_table,
                              max_inflight_dmas=32, out_block_bytes=1 << 20,
                              max_unique_tokens=None):
    """Equivalent of PromptLearner_v4.forward(): the prompt-embedding gather.

    tokenized_prompts     : (n_cls, ctx_len) int
    token_embedding_table : (vocab, dim) float/bf16/... (stays in HBM)
    returns               : (n_cls, ctx_len, dim), dtype of the table
    """
    n_cls, ctx_len = tokenized_prompts.shape
    vocab, dim = token_embedding_table.shape
    dtype = token_embedding_table.dtype
    itemsize = jnp.dtype(dtype).itemsize

    total_rows = n_cls * ctx_len
    sub = max(8, 32 // itemsize)          # sublane multiple: 8 f32 / 16 bf16 / 32 i8

    # ---- output blocking: ~out_block_bytes per buffer, sublane aligned ------
    rows_per_budget = max(sub, (out_block_bytes // (dim * itemsize)) // sub * sub)
    rows_rounded = ((total_rows + sub - 1) // sub) * sub
    blk_rows = int(min(rows_per_budget, rows_rounded))
    padded_rows = ((total_rows + blk_rows - 1) // blk_rows) * blk_rows
    n_blocks = padded_rows // blk_rows

    # ---- token dedup in the wrapper (no per-row scalar work in the kernel) --
    # NOTE: out-of-range ids are clipped (DMA-fault guard); nn.Embedding would
    # instead error / read garbage for such ids.
    tok_flat = jnp.clip(tokenized_prompts.reshape(-1).astype(jnp.int32),
                        0, vocab - 1)
    u_pad = min(total_rows, vocab) if max_unique_tokens is None \
        else min(int(max_unique_tokens), total_rows, vocab)
    u_pad = int(((u_pad + 7) // 8) * 8)
    uniq_ids, inv = jnp.unique(tok_flat, size=u_pad, fill_value=-1,
                               return_inverse=True)
    n_uniq = jnp.sum(uniq_ids >= 0).astype(jnp.int32).reshape(1)
    uniq_ids = jnp.clip(uniq_ids, 0, vocab - 1).astype(jnp.int32)  # safe fills
    inv = jnp.reshape(inv, (-1,)).astype(jnp.int32)
    if padded_rows != total_rows:
        inv = jnp.concatenate(
            [inv, jnp.zeros((padded_rows - total_rows,), jnp.int32)])

    # ---- DMA ring depth: power of two so slot = t & (ring-1) ----------------
    ring = 1
    while ring * 2 <= min(max_inflight_dmas, u_pad):
        ring *= 2

    unroll = 8                             # blk_rows is always a multiple of 8

    def kernel(nuq_ref, uid_ref, inv_ref, table_hbm, out_ref, uniq_rows, sem):
        blk = pl.program_id(0)

        # ---- phase 1 (block 0 only): gather the unique rows HBM -> VMEM ----
        @pl.when(blk == 0)
        def _gather():
            n_u = nuq_ref[0]

            def start_row(u, slot, tok):
                pltpu.make_async_copy(
                    table_hbm.at[pl.ds(tok, 1), :],
                    uniq_rows.at[pl.ds(u, 1), :],
                    sem.at[slot]).start()

            def wait_slot(slot):
                # Waiting only needs the semaphore + byte count: use fixed
                # rows so nothing scalar sits on the wait path.
                pltpu.make_async_copy(
                    table_hbm.at[pl.ds(0, 1), :],
                    uniq_rows.at[pl.ds(0, 1), :],
                    sem.at[slot]).wait()

            # Prime the ring.
            for u in range(ring):                       # ring <= u_pad
                tok_u = uid_ref[u]

                @pl.when(u < n_u)
                def _(u=u, tok_u=tok_u):
                    start_row(u, u, tok_u)

            # Steady state: wait a slot, immediately refill it.
            @pl.loop(0, n_u)
            def _(t):
                slot = t & (ring - 1)
                nxt = jnp.minimum(t + ring, u_pad - 1)
                tok_next = uid_ref[nxt]                 # SMEM read BEFORE wait
                wait_slot(slot)

                @pl.when(t + ring < n_u)
                def _():
                    start_row(t + ring, slot, tok_next)

        # ---- phase 2 (every block): assemble output rows from the cache ----
        base = blk * blk_rows

        def body(s, carry):
            t0 = pl.multiple_of(s * unroll, unroll)
            g0 = base + t0
            for j in range(unroll):
                idx = inv_ref[g0 + j]
                out_ref[pl.ds(t0 + j, 1), :] = uniq_rows[pl.ds(idx, 1), :]
            return carry

        lax.fori_loop(0, blk_rows // unroll, body, 0)

    vmem_need = u_pad * dim * itemsize + 2 * blk_rows * dim * itemsize
    vmem_limit = int(min(max(vmem_need + (4 << 20), 32 << 20), 128 << 20))

    grid_spec = pltpu.PrefetchScalarGridSpec(
        num_scalar_prefetch=3,                          # n_uniq, uniq_ids, inv
        grid=(n_blocks,),
        in_specs=[pl.BlockSpec(memory_space=pl.ANY)],   # table stays in HBM
        out_specs=pl.BlockSpec((blk_rows, dim), lambda i, *_: (i, 0)),
        scratch_shapes=[
            pltpu.VMEM((u_pad, dim), dtype),            # unique-row cache
            pltpu.SemaphoreType.DMA((ring,)),
        ],
    )

    out = pl.pallas_call(
        kernel,
        out_shape=jax.ShapeDtypeStruct((padded_rows, dim), dtype),
        grid_spec=grid_spec,
        compiler_params=pltpu.CompilerParams(
            # "arbitrary": the row cache is filled at block 0 and reused by all
            # later blocks (scratch persists across the sequential grid).
            dimension_semantics=("arbitrary",),
            vmem_limit_bytes=vmem_limit),
    )(n_uniq, uniq_ids, inv, token_embedding_table)

    return out[:total_rows].reshape(n_cls, ctx_len, dim)


if __name__ == "__main__":
    def make_clip_like_tokens(key, n_cls, ctx_len, vocab, name_len):
        # CLIP-style prompts: SOS, template/name tokens, EOT, zero padding.
        # Heavy token reuse across classes -> exercises the dedup path.
        sos, eot = vocab - 2, vocab - 1
        body = jax.random.randint(key, (n_cls, ctx_len), 1, vocab - 2,
                                  dtype=jnp.int32)
        col = jnp.arange(ctx_len)[None, :]
        toks = jnp.where(col == 0, sos, body)
        toks = jnp.where(col == name_len + 1, eot, toks)
        toks = jnp.where(col > name_len + 1, 0, toks)
        return toks

    # TODO(synk): the CLIP tokenizer and pretrained token_embedding weights are
    # replaced by deterministic synthetic token ids and a random table.
    key = jax.random.PRNGKey(0)
    k1a, k1b, k2a, k2b = jax.random.split(key, 4)

    cases = [
        # (n_cls, ctx_len, vocab, dim, name_len, key_tok, key_emb, blk_bytes)
        (16, 16, 512, 128, 6, k1a, k1b, 1 << 20),   # aligned, single block
        (3, 7, 300, 256, 4, k2a, k2b, 1 << 20),     # odd shapes -> row padding
        (16, 16, 512, 128, 6, k1a, k1b, 16 << 10),  # small blocks -> multi-block
    ]

    ok = True
    for n_cls, ctx_len, vocab, dim, name_len, kt, ke, bb in cases:
        toks = make_clip_like_tokens(kt, n_cls, ctx_len, vocab, name_len)
        table = jax.random.normal(ke, (vocab, dim), dtype=jnp.float32)
        out = jax.block_until_ready(
            prompt_learner_v4_forward(toks, table, out_block_bytes=bb))
        ref = jnp.take(table, toks, axis=0)           # nn.Embedding reference
        assert out.shape == (n_cls, ctx_len, dim)
        ok &= bool(jnp.array_equal(out, ref))
    assert ok
    print("KERNEL_OK")
</pallas_src>

<mosaic_0001>
module attributes {stable_mosaic.version = 11 : i64} {
  func.func @kernel(%arg0: i32, %arg1: memref<1xi32, #tpu.memory_space<smem>>, %arg2: memref<256xi32, #tpu.memory_space<smem>>, %arg3: memref<256xi32, #tpu.memory_space<smem>>, %arg4: memref<512x128xf32, #tpu.memory_space<any>>, %arg5: memref<256x128xf32, #tpu.memory_space<vmem>>, %arg6: memref<256x128xf32, #tpu.memory_space<vmem>>, %arg7: memref<32x!tpu.dma_semaphore, #tpu.memory_space<semaphore_mem>>) attributes {dimension_semantics = [#tpu.dimension_semantics<arbitrary>], iteration_bounds = array<i64: 1>, scalar_prefetch = 3 : i64, scratch_operands = 2 : i64, tpu.core_type = #tpu.core_type<tc>, window_params = [{}, {transform_indices = @transform_1, window_bounds = array<i64: 256, 128>}]} {
    %c0_i32 = arith.constant 0 : i32
    %0 = arith.cmpi eq, %arg0, %c0_i32 : i32
    %1 = arith.extui %0 : i1 to i32
    %c0_i32_0 = arith.constant 0 : i32
    %2 = arith.cmpi ne, %1, %c0_i32_0 : i32
    scf.if %2 {
      %c0 = arith.constant 0 : index
      %5 = memref.load %arg1[%c0] : memref<1xi32, #tpu.memory_space<smem>>
      %c0_3 = arith.constant 0 : index
      %6 = memref.load %arg2[%c0_3] : memref<256xi32, #tpu.memory_space<smem>>
      %c0_i32_4 = arith.constant 0 : i32
      %7 = arith.cmpi sgt, %5, %c0_i32_4 : i32
      %8 = arith.extui %7 : i1 to i32
      %c0_i32_5 = arith.constant 0 : i32
      %9 = arith.cmpi ne, %8, %c0_i32_5 : i32
      scf.if %9 {
        %c0_i32_46 = arith.constant 0 : i32
        %c0_i32_47 = arith.constant 0 : i32
        %140 = tpu.memref_slice %arg4[%6, %c0_i32_47] : memref<512x128xf32, #tpu.memory_space<any>> -> memref<1x128xf32, #tpu.memory_space<any>>
        %c0_i32_48 = arith.constant 0 : i32
        %c0_i32_49 = arith.constant 0 : i32
        %141 = tpu.memref_slice %arg6[%c0_i32_48, %c0_i32_49] : memref<256x128xf32, #tpu.memory_space<vmem>> -> memref<1x128xf32, #tpu.memory_space<vmem>>
        %142 = tpu.memref_slice %arg7[%c0_i32_46] : memref<32x!tpu.dma_semaphore, #tpu.memory_space<semaphore_mem>> -> memref<1x!tpu.dma_semaphore, #tpu.memory_space<semaphore_mem>>
        %143 = tpu.memref_squeeze %142 : memref<1x!tpu.dma_semaphore, #tpu.memory_space<semaphore_mem>> -> memref<!tpu.dma_semaphore, #tpu.memory_space<semaphore_mem>>
        tpu.enqueue_dma source(%140 : memref<1x128xf32, #tpu.memory_space<any>>) target(%141 : memref<1x128xf32, #tpu.memory_space<vmem>>) target_semaphore(%143 : memref<!tpu.dma_semaphore, #tpu.memory_space<semaphore_mem>>)
      } else {
      }
      %c1 = arith.constant 1 : index
      %10 = memref.load %arg2[%c1] : memref<256xi32, #tpu.memory_space<smem>>
      %c1_i32_6 = arith.constant 1 : i32
      %11 = arith.cmpi sgt, %5, %c1_i32_6 : i32
      %12 = arith.extui %11 : i1 to i32
      %c0_i32_7 = arith.constant 0 : i32
      %13 = arith.cmpi ne, %12, %c0_i32_7 : i32
      scf.if %13 {
        %c1_i32_46 = arith.constant 1 : i32
        %c0_i32_47 = arith.constant 0 : i32
        %140 = tpu.memref_slice %arg4[%10, %c0_i32_47] : memref<512x128xf32, #tpu.memory_space<any>> -> memref<1x128xf32, #tpu.memory_space<any>>
        %c1_i32_48 = arith.constant 1 : i32
        %c0_i32_49 = arith.constant 0 : i32
        %141 = tpu.memref_slice %arg6[%c1_i32_48, %c0_i32_49] : memref<256x128xf32, #tpu.memory_space<vmem>> -> memref<1x128xf32, #tpu.memory_space<vmem>>
        %142 = tpu.memref_slice %arg7[%c1_i32_46] : memref<32x!tpu.dma_semaphore, #tpu.memory_space<semaphore_mem>> -> memref<1x!tpu.dma_semaphore, #tpu.memory_space<semaphore_mem>>
        %143 = tpu.memref_squeeze %142 : memref<1x!tpu.dma_semaphore, #tpu.memory_space<semaphore_mem>> -> memref<!tpu.dma_semaphore, #tpu.memory_space<semaphore_mem>>
        tpu.enqueue_dma source(%140 : memref<1x128xf32, #tpu.memory_space<any>>) target(%141 : memref<1x128xf32, #tpu.memory_space<vmem>>) target_semaphore(%143 : memref<!tpu.dma_semaphore, #tpu.memory_space<semaphore_mem>>)
      } else {
      }
      %c2 = arith.constant 2 : index
      %14 = memref.load %arg2[%c2] : memref<256xi32, #tpu.memory_space<smem>>
      %c2_i32 = arith.constant 2 : i32
      %15 = arith.cmpi sgt, %5, %c2_i32 : i32
      %16 = arith.extui %15 : i1 to i32
      %c0_i32_8 = arith.constant 0 : i32
      %17 = arith.cmpi ne, %16, %c0_i32_8 : i32
      scf.if %17 {
        %c2_i32_46 = arith.constant 2 : i32
        %c0_i32_47 = arith.constant 0 : i32
        %140 = tpu.memref_slice %arg4[%14, %c0_i32_47] : memref<512x128xf32, #tpu.memory_space<any>> -> memref<1x128xf32, #tpu.memory_space<any>>
        %c2_i32_48 = arith.constant 2 : i32
        %c0_i32_49 = arith.constant 0 : i32
        %141 = tpu.memref_slice %arg6[%c2_i32_48, %c0_i32_49] : memref<256x128xf32, #tpu.memory_space<vmem>> -> memref<1x128xf32, #tpu.memory_space<vmem>>
        %142 = tpu.memref_slice %arg7[%c2_i32_46] : memref<32x!tpu.dma_semaphore, #tpu.memory_space<semaphore_mem>> -> memref<1x!tpu.dma_semaphore, #tpu.memory_space<semaphore_mem>>
        %143 = tpu.memref_squeeze %142 : memref<1x!tpu.dma_semaphore, #tpu.memory_space<semaphore_mem>> -> memref<!tpu.dma_semaphore, #tpu.memory_space<semaphore_mem>>
        tpu.enqueue_dma source(%140 : memref<1x128xf32, #tpu.memory_space<any>>) target(%141 : memref<1x128xf32, #tpu.memory_space<vmem>>) target_semaphore(%143 : memref<!tpu.dma_semaphore, #tpu.memory_space<semaphore_mem>>)
      } else {
      }
      %c3 = arith.constant 3 : index
      %18 = memref.load %arg2[%c3] : memref<256xi32, #tpu.memory_space<smem>>
      %c3_i32 = arith.constant 3 : i32
      %19 = arith.cmpi sgt, %5, %c3_i32 : i32
      %20 = arith.extui %19 : i1 to i32
      %c0_i32_9 = arith.constant 0 : i32
      %21 = arith.cmpi ne, %20, %c0_i32_9 : i32
      scf.if %21 {
        %c3_i32_46 = arith.constant 3 : i32
        %c0_i32_47 = arith.constant 0 : i32
        %140 = tpu.memref_slice %arg4[%18, %c0_i32_47] : memref<512x128xf32, #tpu.memory_space<any>> -> memref<1x128xf32, #tpu.memory_space<any>>
        %c3_i32_48 = arith.constant 3 : i32
        %c0_i32_49 = arith.constant 0 : i32
        %141 = tpu.memref_slice %arg6[%c3_i32_48, %c0_i32_49] : memref<256x128xf32, #tpu.memory_space<vmem>> -> memref<1x128xf32, #tpu.memory_space<vmem>>
        %142 = tpu.memref_slice %arg7[%c3_i32_46] : memref<32x!tpu.dma_semaphore, #tpu.memory_space<semaphore_mem>> -> memref<1x!tpu.dma_semaphore, #tpu.memory_space<semaphore_mem>>
        %143 = tpu.memref_squeeze %142 : memref<1x!tpu.dma_semaphore, #tpu.memory_space<semaphore_mem>> -> memref<!tpu.dma_semaphore, #tpu.memory_space<semaphore_mem>>
        tpu.enqueue_dma source(%140 : memref<1x128xf32, #tpu.memory_space<any>>) target(%141 : memref<1x128xf32, #tpu.memory_space<vmem>>) target_semaphore(%143 : memref<!tpu.dma_semaphore, #tpu.memory_space<semaphore_mem>>)
      } else {
      }
      %c4 = arith.constant 4 : index
      %22 = memref.load %arg2[%c4] : memref<256xi32, #tpu.memory_space<smem>>
      %c4_i32 = arith.constant 4 : i32
      %23 = arith.cmpi sgt, %5, %c4_i32 : i32
      %24 = arith.extui %23 : i1 to i32
      %c0_i32_10 = arith.constant 0 : i32
      %25 = arith.cmpi ne, %24, %c0_i32_10 : i32
      scf.if %25 {
        %c4_i32_46 = arith.constant 4 : i32
        %c0_i32_47 = arith.constant 0 : i32
        %140 = tpu.memref_slice %arg4[%22, %c0_i32_47] : memref<512x128xf32, #tpu.memory_space<any>> -> memref<1x128xf32, #tpu.memory_space<any>>
        %c4_i32_48 = arith.constant 4 : i32
        %c0_i32_49 = arith.constant 0 : i32
        %141 = tpu.memref_slice %arg6[%c4_i32_48, %c0_i32_49] : memref<256x128xf32, #tpu.memory_space<vmem>> -> memref<1x128xf32, #tpu.memory_space<vmem>>
        %142 = tpu.memref_slice %arg7[%c4_i32_46] : memref<32x!tpu.dma_semaphore, #tpu.memory_space<semaphore_mem>> -> memref<1x!tpu.dma_semaphore, #tpu.memory_space<semaphore_mem>>
        %143 = tpu.memref_squeeze %142 : memref<1x!tpu.dma_semaphore, #tpu.memory_space<semaphore_mem>> -> memref<!tpu.dma_semaphore, #tpu.memory_space<semaphore_mem>>
        tpu.enqueue_dma source(%140 : memref<1x128xf32, #tpu.memory_space<any>>) target(%141 : memref<1x128xf32, #tpu.memory_space<vmem>>) target_semaphore(%143 : memref<!tpu.dma_semaphore, #tpu.memory_space<semaphore_mem>>)
      } else {
      }
      %c5 = arith.constant 5 : index
      %26 = memref.load %arg2[%c5] : memref<256xi32, #tpu.memory_space<smem>>
      %c5_i32 = arith.constant 5 : i32
      %27 = arith.cmpi sgt, %5, %c5_i32 : i32
      %28 = arith.extui %27 : i1 to i32
      %c0_i32_11 = arith.constant 0 : i32
      %29 = arith.cmpi ne, %28, %c0_i32_11 : i32
      scf.if %29 {
        %c5_i32_46 = arith.constant 5 : i32
        %c0_i32_47 = arith.constant 0 : i32
        %140 = tpu.memref_slice %arg4[%26, %c0_i32_47] : memref<512x128xf32, #tpu.memory_space<any>> -> memref<1x128xf32, #tpu.memory_space<any>>
        %c5_i32_48 = arith.constant 5 : i32
        %c0_i32_49 = arith.constant 0 : i32
        %141 = tpu.memref_slice %arg6[%c5_i32_48, %c0_i32_49] : memref<256x128xf32, #tpu.memory_space<vmem>> -> memref<1x128xf32, #tpu.memory_space<vmem>>
        %142 = tpu.memref_slice %arg7[%c5_i32_46] : memref<32x!tpu.dma_semaphore, #tpu.memory_space<semaphore_mem>> -> memref<1x!tpu.dma_semaphore, #tpu.memory_space<semaphore_mem>>
        %143 = tpu.memref_squeeze %142 : memref<1x!tpu.dma_semaphore, #tpu.memory_space<semaphore_mem>> -> memref<!tpu.dma_semaphore, #tpu.memory_space<semaphore_mem>>
        tpu.enqueue_dma source(%140 : memref<1x128xf32, #tpu.memory_space<any>>) target(%141 : memref<1x128xf32, #tpu.memory_space<vmem>>) target_semaphore(%143 : memref<!tpu.dma_semaphore, #tpu.memory_space<semaphore_mem>>)
      } else {
      }
      %c6 = arith.constant 6 : index
      %30 = memref.load %arg2[%c6] : memref<256xi32, #tpu.memory_space<smem>>
      %c6_i32 = arith.constant 6 : i32
      %31 = arith.cmpi sgt, %5, %c6_i32 : i32
      %32 = arith.extui %31 : i1 to i32
      %c0_i32_12 = arith.constant 0 : i32
      %33 = arith.cmpi ne, %32, %c0_i32_12 : i32
      scf.if %33 {
        %c6_i32_46 = arith.constant 6 : i32
        %c0_i32_47 = arith.constant 0 : i32
        %140 = tpu.memref_slice %arg4[%30, %c0_i32_47] : memref<512x128xf32, #tpu.memory_space<any>> -> memref<1x128xf32, #tpu.memory_space<any>>
        %c6_i32_48 = arith.constant 6 : i32
        %c0_i32_49 = arith.constant 0 : i32
        %141 = tpu.memref_slice %arg6[%c6_i32_48, %c0_i32_49] : memref<256x128xf32, #tpu.memory_space<vmem>> -> memref<1x128xf32, #tpu.memory_space<vmem>>
        %142 = tpu.memref_slice %arg7[%c6_i32_46] : memref<32x!tpu.dma_semaphore, #tpu.memory_space<semaphore_mem>> -> memref<1x!tpu.dma_semaphore, #tpu.memory_space<semaphore_mem>>
        %143 = tpu.memref_squeeze %142 : memref<1x!tpu.dma_semaphore, #tpu.memory_space<semaphore_mem>> -> memref<!tpu.dma_semaphore, #tpu.memory_space<semaphore_mem>>
        tpu.enqueue_dma source(%140 : memref<1x128xf32, #tpu.memory_space<any>>) target(%141 : memref<1x128xf32, #tpu.memory_space<vmem>>) target_semaphore(%143 : memref<!tpu.dma_semaphore, #tpu.memory_space<semaphore_mem>>)
      } else {
      }
      %c7 = arith.constant 7 : index
      %34 = memref.load %arg2[%c7] : memref<256xi32, #tpu.memory_space<smem>>
      %c7_i32 = arith.constant 7 : i32
      %35 = arith.cmpi sgt, %5, %c7_i32 : i32
      %36 = arith.extui %35 : i1 to i32
      %c0_i32_13 = arith.constant 0 : i32
      %37 = arith.cmpi ne, %36, %c0_i32_13 : i32
      scf.if %37 {
        %c7_i32_46 = arith.constant 7 : i32
        %c0_i32_47 = arith.constant 0 : i32
        %140 = tpu.memref_slice %arg4[%34, %c0_i32_47] : memref<512x128xf32, #tpu.memory_space<any>> -> memref<1x128xf32, #tpu.memory_space<any>>
        %c7_i32_48 = arith.constant 7 : i32
        %c0_i32_49 = arith.constant 0 : i32
        %141 = tpu.memref_slice %arg6[%c7_i32_48, %c0_i32_49] : memref<256x128xf32, #tpu.memory_space<vmem>> -> memref<1x128xf32, #tpu.memory_space<vmem>>
        %142 = tpu.memref_slice %arg7[%c7_i32_46] : memref<32x!tpu.dma_semaphore, #tpu.memory_space<semaphore_mem>> -> memref<1x!tpu.dma_semaphore, #tpu.memory_space<semaphore_mem>>
        %143 = tpu.memref_squeeze %142 : memref<1x!tpu.dma_semaphore, #tpu.memory_space<semaphore_mem>> -> memref<!tpu.dma_semaphore, #tpu.memory_space<semaphore_mem>>
        tpu.enqueue_dma source(%140 : memref<1x128xf32, #tpu.memory_space<any>>) target(%141 : memref<1x128xf32, #tpu.memory_space<vmem>>) target_semaphore(%143 : memref<!tpu.dma_semaphore, #tpu.memory_space<semaphore_mem>>)
      } else {
      }
      %c8 = arith.constant 8 : index
      %38 = memref.load %arg2[%c8] : memref<256xi32, #tpu.memory_space<smem>>
      %c8_i32 = arith.constant 8 : i32
      %39 = arith.cmpi sgt, %5, %c8_i32 : i32
      %40 = arith.extui %39 : i1 to i32
      %c0_i32_14 = arith.constant 0 : i32
      %41 = arith.cmpi ne, %40, %c0_i32_14 : i32
      scf.if %41 {
        %c8_i32_46 = arith.constant 8 : i32
        %c0_i32_47 = arith.constant 0 : i32
        %140 = tpu.memref_slice %arg4[%38, %c0_i32_47] : memref<512x128xf32, #tpu.memory_space<any>> -> memref<1x128xf32, #tpu.memory_space<any>>
        %c8_i32_48 = arith.constant 8 : i32
        %c0_i32_49 = arith.constant 0 : i32
        %141 = tpu.memref_slice %arg6[%c8_i32_48, %c0_i32_49] : memref<256x128xf32, #tpu.memory_space<vmem>> -> memref<1x128xf32, #tpu.memory_space<vmem>>
        %142 = tpu.memref_slice %arg7[%c8_i32_46] : memref<32x!tpu.dma_semaphore, #tpu.memory_space<semaphore_mem>> -> memref<1x!tpu.dma_semaphore, #tpu.memory_space<semaphore_mem>>
        %143 = tpu.memref_squeeze %142 : memref<1x!tpu.dma_semaphore, #tpu.memory_space<semaphore_mem>> -> memref<!tpu.dma_semaphore, #tpu.memory_space<semaphore_mem>>
        tpu.enqueue_dma source(%140 : memref<1x128xf32, #tpu.memory_space<any>>) target(%141 : memref<1x128xf32, #tpu.memory_space<vmem>>) target_semaphore(%143 : memref<!tpu.dma_semaphore, #tpu.memory_space<semaphore_mem>>)
      } else {
      }
      %c9 = arith.constant 9 : index
      %42 = memref.load %arg2[%c9] : memref<256xi32, #tpu.memory_space<smem>>
      %c9_i32 = arith.constant 9 : i32
      %43 = arith.cmpi sgt, %5, %c9_i32 : i32
      %44 = arith.extui %43 : i1 to i32
      %c0_i32_15 = arith.constant 0 : i32
      %45 = arith.cmpi ne, %44, %c0_i32_15 : i32
      scf.if %45 {
        %c9_i32_46 = arith.constant 9 : i32
        %c0_i32_47 = arith.constant 0 : i32
        %140 = tpu.memref_slice %arg4[%42, %c0_i32_47] : memref<512x128xf32, #tpu.memory_space<any>> -> memref<1x128xf32, #tpu.memory_space<any>>
        %c9_i32_48 = arith.constant 9 : i32
        %c0_i32_49 = arith.constant 0 : i32
        %141 = tpu.memref_slice %arg6[%c9_i32_48, %c0_i32_49] : memref<256x128xf32, #tpu.memory_space<vmem>> -> memref<1x128xf32, #tpu.memory_space<vmem>>
        %142 = tpu.memref_slice %arg7[%c9_i32_46] : memref<32x!tpu.dma_semaphore, #tpu.memory_space<semaphore_mem>> -> memref<1x!tpu.dma_semaphore, #tpu.memory_space<semaphore_mem>>
        %143 = tpu.memref_squeeze %142 : memref<1x!tpu.dma_semaphore, #tpu.memory_space<semaphore_mem>> -> memref<!tpu.dma_semaphore, #tpu.memory_space<semaphore_mem>>
        tpu.enqueue_dma source(%140 : memref<1x128xf32, #tpu.memory_space<any>>) target(%141 : memref<1x128xf32, #tpu.memory_space<vmem>>) target_semaphore(%143 : memref<!tpu.dma_semaphore, #tpu.memory_space<semaphore_mem>>)
      } else {
      }
      %c10 = arith.constant 10 : index
      %46 = memref.load %arg2[%c10] : memref<256xi32, #tpu.memory_space<smem>>
      %c10_i32 = arith.constant 10 : i32
      %47 = arith.cmpi sgt, %5, %c10_i32 : i32
      %48 = arith.extui %47 : i1 to i32
      %c0_i32_16 = arith.constant 0 : i32
      %49 = arith.cmpi ne, %48, %c0_i32_16 : i32
      scf.if %49 {
        %c10_i32_46 = arith.constant 10 : i32
        %c0_i32_47 = arith.constant 0 : i32
        %140 = tpu.memref_slice %arg4[%46, %c0_i32_47] : memref<512x128xf32, #tpu.memory_space<any>> -> memref<1x128xf32, #tpu.memory_space<any>>
        %c10_i32_48 = arith.constant 10 : i32
        %c0_i32_49 = arith.constant 0 : i32
        %141 = tpu.memref_slice %arg6[%c10_i32_48, %c0_i32_49] : memref<256x128xf32, #tpu.memory_space<vmem>> -> memref<1x128xf32, #tpu.memory_space<vmem>>
        %142 = tpu.memref_slice %arg7[%c10_i32_46] : memref<32x!tpu.dma_semaphore, #tpu.memory_space<semaphore_mem>> -> memref<1x!tpu.dma_semaphore, #tpu.memory_space<semaphore_mem>>
        %143 = tpu.memref_squeeze %142 : memref<1x!tpu.dma_semaphore, #tpu.memory_space<semaphore_mem>> -> memref<!tpu.dma_semaphore, #tpu.memory_space<semaphore_mem>>
        tpu.enqueue_dma source(%140 : memref<1x128xf32, #tpu.memory_space<any>>) target(%141 : memref<1x128xf32, #tpu.memory_space<vmem>>) target_semaphore(%143 : memref<!tpu.dma_semaphore, #tpu.memory_space<semaphore_mem>>)
      } else {
      }
      %c11 = arith.constant 11 : index
      %50 = memref.load %arg2[%c11] : memref<256xi32, #tpu.memory_space<smem>>
      %c11_i32 = arith.constant 11 : i32
      %51 = arith.cmpi sgt, %5, %c11_i32 : i32
      %52 = arith.extui %51 : i1 to i32
      %c0_i32_17 = arith.constant 0 : i32
      %53 = arith.cmpi ne, %52, %c0_i32_17 : i32
      scf.if %53 {
        %c11_i32_46 = arith.constant 11 : i32
        %c0_i32_47 = arith.constant 0 : i32
        %140 = tpu.memref_slice %arg4[%50, %c0_i32_47] : memref<512x128xf32, #tpu.memory_space<any>> -> memref<1x128xf32, #tpu.memory_space<any>>
        %c11_i32_48 = arith.constant 11 : i32
        %c0_i32_49 = arith.constant 0 : i32
        %141 = tpu.memref_slice %arg6[%c11_i32_48, %c0_i32_49] : memref<256x128xf32, #tpu.memory_space<vmem>> -> memref<1x128xf32, #tpu.memory_space<vmem>>
        %142 = tpu.memref_slice %arg7[%c11_i32_46] : memref<32x!tpu.dma_semaphore, #tpu.memory_space<semaphore_mem>> -> memref<1x!tpu.dma_semaphore, #tpu.memory_space<semaphore_mem>>
        %143 = tpu.memref_squeeze %142 : memref<1x!tpu.dma_semaphore, #tpu.memory_space<semaphore_mem>> -> memref<!tpu.dma_semaphore, #tpu.memory_space<semaphore_mem>>
        tpu.enqueue_dma source(%140 : memref<1x128xf32, #tpu.memory_space<any>>) target(%141 : memref<1x128xf32, #tpu.memory_space<vmem>>) target_semaphore(%143 : memref<!tpu.dma_semaphore, #tpu.memory_space<semaphore_mem>>)
      } else {
      }
      %c12 = arith.constant 12 : index
      %54 = memref.load %arg2[%c12] : memref<256xi32, #tpu.memory_space<smem>>
      %c12_i32 = arith.constant 12 : i32
      %55 = arith.cmpi sgt, %5, %c12_i32 : i32
      %56 = arith.extui %55 : i1 to i32
      %c0_i32_18 = arith.constant 0 : i32
      %57 = arith.cmpi ne, %56, %c0_i32_18 : i32
      scf.if %57 {
        %c12_i32_46 = arith.constant 12 : i32
        %c0_i32_47 = arith.constant 0 : i32
        %140 = tpu.memref_slice %arg4[%54, %c0_i32_47] : memref<512x128xf32, #tpu.memory_space<any>> -> memref<1x128xf32, #tpu.memory_space<any>>
        %c12_i32_48 = arith.constant 12 : i32
        %c0_i32_49 = arith.constant 0 : i32
        %141 = tpu.memref_slice %arg6[%c12_i32_48, %c0_i32_49] : memref<256x128xf32, #tpu.memory_space<vmem>> -> memref<1x128xf32, #tpu.memory_space<vmem>>
        %142 = tpu.memref_slice %arg7[%c12_i32_46] : memref<32x!tpu.dma_semaphore, #tpu.memory_space<semaphore_mem>> -> memref<1x!tpu.dma_semaphore, #tpu.memory_space<semaphore_mem>>
        %143 = tpu.memref_squeeze %142 : memref<1x!tpu.dma_semaphore, #tpu.memory_space<semaphore_mem>> -> memref<!tpu.dma_semaphore, #tpu.memory_space<semaphore_mem>>
        tpu.enqueue_dma source(%140 : memref<1x128xf32, #tpu.memory_space<any>>) target(%141 : memref<1x128xf32, #tpu.memory_space<vmem>>) target_semaphore(%143 : memref<!tpu.dma_semaphore, #tpu.memory_space<semaphore_mem>>)
      } else {
      }
      %c13 = arith.constant 13 : index
      %58 = memref.load %arg2[%c13] : memref<256xi32, #tpu.memory_space<smem>>
      %c13_i32 = arith.constant 13 : i32
      %59 = arith.cmpi sgt, %5, %c13_i32 : i32
      %60 = arith.extui %59 : i1 to i32
      %c0_i32_19 = arith.constant 0 : i32
      %61 = arith.cmpi ne, %60, %c0_i32_19 : i32
      scf.if %61 {
        %c13_i32_46 = arith.constant 13 : i32
        %c0_i32_47 = arith.constant 0 : i32
        %140 = tpu.memref_slice %arg4[%58, %c0_i32_47] : memref<512x128xf32, #tpu.memory_space<any>> -> memref<1x128xf32, #tpu.memory_space<any>>
        %c13_i32_48 = arith.constant 13 : i32
        %c0_i32_49 = arith.constant 0 : i32
        %141 = tpu.memref_slice %arg6[%c13_i32_48, %c0_i32_49] : memref<256x128xf32, #tpu.memory_space<vmem>> -> memref<1x128xf32, #tpu.memory_space<vmem>>
        %142 = tpu.memref_slice %arg7[%c13_i32_46] : memref<32x!tpu.dma_semaphore, #tpu.memory_space<semaphore_mem>> -> memref<1x!tpu.dma_semaphore, #tpu.memory_space<semaphore_mem>>
        %143 = tpu.memref_squeeze %142 : memref<1x!tpu.dma_semaphore, #tpu.memory_space<semaphore_mem>> -> memref<!tpu.dma_semaphore, #tpu.memory_space<semaphore_mem>>
        tpu.enqueue_dma source(%140 : memref<1x128xf32, #tpu.memory_space<any>>) target(%141 : memref<1x128xf32, #tpu.memory_space<vmem>>) target_semaphore(%143 : memref<!tpu.dma_semaphore, #tpu.memory_space<semaphore_mem>>)
      } else {
      }
      %c14 = arith.constant 14 : index
      %62 = memref.load %arg2[%c14] : memref<256xi32, #tpu.memory_space<smem>>
      %c14_i32 = arith.constant 14 : i32
      %63 = arith.cmpi sgt, %5, %c14_i32 : i32
      %64 = arith.extui %63 : i1 to i32
      %c0_i32_20 = arith.constant 0 : i32
      %65 = arith.cmpi ne, %64, %c0_i32_20 : i32
      scf.if %65 {
        %c14_i32_46 = arith.constant 14 : i32
        %c0_i32_47 = arith.constant 0 : i32
        %140 = tpu.memref_slice %arg4[%62, %c0_i32_47] : memref<512x128xf32, #tpu.memory_space<any>> -> memref<1x128xf32, #tpu.memory_space<any>>
        %c14_i32_48 = arith.constant 14 : i32
        %c0_i32_49 = arith.constant 0 : i32
        %141 = tpu.memref_slice %arg6[%c14_i32_48, %c0_i32_49] : memref<256x128xf32, #tpu.memory_space<vmem>> -> memref<1x128xf32, #tpu.memory_space<vmem>>
        %142 = tpu.memref_slice %arg7[%c14_i32_46] : memref<32x!tpu.dma_semaphore, #tpu.memory_space<semaphore_mem>> -> memref<1x!tpu.dma_semaphore, #tpu.memory_space<semaphore_mem>>
        %143 = tpu.memref_squeeze %142 : memref<1x!tpu.dma_semaphore, #tpu.memory_space<semaphore_mem>> -> memref<!tpu.dma_semaphore, #tpu.memory_space<semaphore_mem>>
        tpu.enqueue_dma source(%140 : memref<1x128xf32, #tpu.memory_space<any>>) target(%141 : memref<1x128xf32, #tpu.memory_space<vmem>>) target_semaphore(%143 : memref<!tpu.dma_semaphore, #tpu.memory_space<semaphore_mem>>)
      } else {
      }
      %c15 = arith.constant 15 : index
      %66 = memref.load %arg2[%c15] : memref<256xi32, #tpu.memory_space<smem>>
      %c15_i32 = arith.constant 15 : i32
      %67 = arith.cmpi sgt, %5, %c15_i32 : i32
      %68 = arith.extui %67 : i1 to i32
      %c0_i32_21 = arith.constant 0 : i32
      %69 = arith.cmpi ne, %68, %c0_i32_21 : i32
      scf.if %69 {
        %c15_i32_46 = arith.constant 15 : i32
        %c0_i32_47 = arith.constant 0 : i32
        %140 = tpu.memref_slice %arg4[%66, %c0_i32_47] : memref<512x128xf32, #tpu.memory_space<any>> -> memref<1x128xf32, #tpu.memory_space<any>>
        %c15_i32_48 = arith.constant 15 : i32
        %c0_i32_49 = arith.constant 0 : i32
        %141 = tpu.memref_slice %arg6[%c15_i32_48, %c0_i32_49] : memref<256x128xf32, #tpu.memory_space<vmem>> -> memref<1x128xf32, #tpu.memory_space<vmem>>
        %142 = tpu.memref_slice %arg7[%c15_i32_46] : memref<32x!tpu.dma_semaphore, #tpu.memory_space<semaphore_mem>> -> memref<1x!tpu.dma_semaphore, #tpu.memory_space<semaphore_mem>>
        %143 = tpu.memref_squeeze %142 : memref<1x!tpu.dma_semaphore, #tpu.memory_space<semaphore_mem>> -> memref<!tpu.dma_semaphore, #tpu.memory_space<semaphore_mem>>
        tpu.enqueue_dma source(%140 : memref<1x128xf32, #tpu.memory_space<any>>) target(%141 : memref<1x128xf32, #tpu.memory_space<vmem>>) target_semaphore(%143 : memref<!tpu.dma_semaphore, #tpu.memory_space<semaphore_mem>>)
      } else {
      }
      %c16 = arith.constant 16 : index
      %70 = memref.load %arg2[%c16] : memref<256xi32, #tpu.memory_space<smem>>
      %c16_i32 = arith.constant 16 : i32
      %71 = arith.cmpi sgt, %5, %c16_i32 : i32
      %72 = arith.extui %71 : i1 to i32
      %c0_i32_22 = arith.constant 0 : i32
      %73 = arith.cmpi ne, %72, %c0_i32_22 : i32
      scf.if %73 {
        %c16_i32_46 = arith.constant 16 : i32
        %c0_i32_47 = arith.constant 0 : i32
        %140 = tpu.memref_slice %arg4[%70, %c0_i32_47] : memref<512x128xf32, #tpu.memory_space<any>> -> memref<1x128xf32, #tpu.memory_space<any>>
        %c16_i32_48 = arith.constant 16 : i32
        %c0_i32_49 = arith.constant 0 : i32
        %141 = tpu.memref_slice %arg6[%c16_i32_48, %c0_i32_49] : memref<256x128xf32, #tpu.memory_space<vmem>> -> memref<1x128xf32, #tpu.memory_space<vmem>>
        %142 = tpu.memref_slice %arg7[%c16_i32_46] : memref<32x!tpu.dma_semaphore, #tpu.memory_space<semaphore_mem>> -> memref<1x!tpu.dma_semaphore, #tpu.memory_space<semaphore_mem>>
        %143 = tpu.memref_squeeze %142 : memref<1x!tpu.dma_semaphore, #tpu.memory_space<semaphore_mem>> -> memref<!tpu.dma_semaphore, #tpu.memory_space<semaphore_mem>>
        tpu.enqueue_dma source(%140 : memref<1x128xf32, #tpu.memory_space<any>>) target(%141 : memref<1x128xf32, #tpu.memory_space<vmem>>) target_semaphore(%143 : memref<!tpu.dma_semaphore, #tpu.memory_space<semaphore_mem>>)
      } else {
      }
      %c17 = arith.constant 17 : index
      %74 = memref.load %arg2[%c17] : memref<256xi32, #tpu.memory_space<smem>>
      %c17_i32 = arith.constant 17 : i32
      %75 = arith.cmpi sgt, %5, %c17_i32 : i32
      %76 = arith.extui %75 : i1 to i32
      %c0_i32_23 = arith.constant 0 : i32
      %77 = arith.cmpi ne, %76, %c0_i32_23 : i32
      scf.if %77 {
        %c17_i32_46 = arith.constant 17 : i32
        %c0_i32_47 = arith.constant 0 : i32
        %140 = tpu.memref_slice %arg4[%74, %c0_i32_47] : memref<512x128xf32, #tpu.memory_space<any>> -> memref<1x128xf32, #tpu.memory_space<any>>
        %c17_i32_48 = arith.constant 17 : i32
        %c0_i32_49 = arith.constant 0 : i32
        %141 = tpu.memref_slice %arg6[%c17_i32_48, %c0_i32_49] : memref<256x128xf32, #tpu.memory_space<vmem>> -> memref<1x128xf32, #tpu.memory_space<vmem>>
        %142 = tpu.memref_slice %arg7[%c17_i32_46] : memref<32x!tpu.dma_semaphore, #tpu.memory_space<semaphore_mem>> -> memref<1x!tpu.dma_semaphore, #tpu.memory_space<semaphore_mem>>
        %143 = tpu.memref_squeeze %142 : memref<1x!tpu.dma_semaphore, #tpu.memory_space<semaphore_mem>> -> memref<!tpu.dma_semaphore, #tpu.memory_space<semaphore_mem>>
        tpu.enqueue_dma source(%140 : memref<1x128xf32, #tpu.memory_space<any>>) target(%141 : memref<1x128xf32, #tpu.memory_space<vmem>>) target_semaphore(%143 : memref<!tpu.dma_semaphore, #tpu.memory_space<semaphore_mem>>)
      } else {
      }
      %c18 = arith.constant 18 : index
      %78 = memref.load %arg2[%c18] : memref<256xi32, #tpu.memory_space<smem>>
      %c18_i32 = arith.constant 18 : i32
      %79 = arith.cmpi sgt, %5, %c18_i32 : i32
      %80 = arith.extui %79 : i1 to i32
      %c0_i32_24 = arith.constant 0 : i32
      %81 = arith.cmpi ne, %80, %c0_i32_24 : i32
      scf.if %81 {
        %c18_i32_46 = arith.constant 18 : i32
        %c0_i32_47 = arith.constant 0 : i32
        %140 = tpu.memref_slice %arg4[%78, %c0_i32_47] : memref<512x128xf32, #tpu.memory_space<any>> -> memref<1x128xf32, #tpu.memory_space<any>>
        %c18_i32_48 = arith.constant 18 : i32
        %c0_i32_49 = arith.constant 0 : i32
        %141 = tpu.memref_slice %arg6[%c18_i32_48, %c0_i32_49] : memref<256x128xf32, #tpu.memory_space<vmem>> -> memref<1x128xf32, #tpu.memory_space<vmem>>
        %142 = tpu.memref_slice %arg7[%c18_i32_46] : memref<32x!tpu.dma_semaphore, #tpu.memory_space<semaphore_mem>> -> memref<1x!tpu.dma_semaphore, #tpu.memory_space<semaphore_mem>>
        %143 = tpu.memref_squeeze %142 : memref<1x!tpu.dma_semaphore, #tpu.memory_space<semaphore_mem>> -> memref<!tpu.dma_semaphore, #tpu.memory_space<semaphore_mem>>
        tpu.enqueue_dma source(%140 : memref<1x128xf32, #tpu.memory_space<any>>) target(%141 : memref<1x128xf32, #tpu.memory_space<vmem>>) target_semaphore(%143 : memref<!tpu.dma_semaphore, #tpu.memory_space<semaphore_mem>>)
      } else {
      }
      %c19 = arith.constant 19 : index
      %82 = memref.load %arg2[%c19] : memref<256xi32, #tpu.memory_space<smem>>
      %c19_i32 = arith.constant 19 : i32
      %83 = arith.cmpi sgt, %5, %c19_i32 : i32
      %84 = arith.extui %83 : i1 to i32
      %c0_i32_25 = arith.constant 0 : i32
      %85 = arith.cmpi ne, %84, %c0_i32_25 : i32
      scf.if %85 {
        %c19_i32_46 = arith.constant 19 : i32
        %c0_i32_47 = arith.constant 0 : i32
        %140 = tpu.memref_slice %arg4[%82, %c0_i32_47] : memref<512x128xf32, #tpu.memory_space<any>> -> memref<1x128xf32, #tpu.memory_space<any>>
        %c19_i32_48 = arith.constant 19 : i32
        %c0_i32_49 = arith.constant 0 : i32
        %141 = tpu.memref_slice %arg6[%c19_i32_48, %c0_i32_49] : memref<256x128xf32, #tpu.memory_space<vmem>> -> memref<1x128xf32, #tpu.memory_space<vmem>>
        %142 = tpu.memref_slice %arg7[%c19_i32_46] : memref<32x!tpu.dma_semaphore, #tpu.memory_space<semaphore_mem>> -> memref<1x!tpu.dma_semaphore, #tpu.memory_space<semaphore_mem>>
        %143 = tpu.memref_squeeze %142 : memref<1x!tpu.dma_semaphore, #tpu.memory_space<semaphore_mem>> -> memref<!tpu.dma_semaphore, #tpu.memory_space<semaphore_mem>>
        tpu.enqueue_dma source(%140 : memref<1x128xf32, #tpu.memory_space<any>>) target(%141 : memref<1x128xf32, #tpu.memory_space<vmem>>) target_semaphore(%143 : memref<!tpu.dma_semaphore, #tpu.memory_space<semaphore_mem>>)
      } else {
      }
      %c20 = arith.constant 20 : index
      %86 = memref.load %arg2[%c20] : memref<256xi32, #tpu.memory_space<smem>>
      %c20_i32 = arith.constant 20 : i32
      %87 = arith.cmpi sgt, %5, %c20_i32 : i32
      %88 = arith.extui %87 : i1 to i32
      %c0_i32_26 = arith.constant 0 : i32
      %89 = arith.cmpi ne, %88, %c0_i32_26 : i32
      scf.if %89 {
        %c20_i32_46 = arith.constant 20 : i32
        %c0_i32_47 = arith.constant 0 : i32
        %140 = tpu.memref_slice %arg4[%86, %c0_i32_47] : memref<512x128xf32, #tpu.memory_space<any>> -> memref<1x128xf32, #tpu.memory_space<any>>
        %c20_i32_48 = arith.constant 20 : i32
        %c0_i32_49 = arith.constant 0 : i32
        %141 = tpu.memref_slice %arg6[%c20_i32_48, %c0_i32_49] : memref<256x128xf32, #tpu.memory_space<vmem>> -> memref<1x128xf32, #tpu.memory_space<vmem>>
        %142 = tpu.memref_slice %arg7[%c20_i32_46] : memref<32x!tpu.dma_semaphore, #tpu.memory_space<semaphore_mem>> -> memref<1x!tpu.dma_semaphore, #tpu.memory_space<semaphore_mem>>
        %143 = tpu.memref_squeeze %142 : memref<1x!tpu.dma_semaphore, #tpu.memory_space<semaphore_mem>> -> memref<!tpu.dma_semaphore, #tpu.memory_space<semaphore_mem>>
        tpu.enqueue_dma source(%140 : memref<1x128xf32, #tpu.memory_space<any>>) target(%141 : memref<1x128xf32, #tpu.memory_space<vmem>>) target_semaphore(%143 : memref<!tpu.dma_semaphore, #tpu.memory_space<semaphore_mem>>)
      } else {
      }
      %c21 = arith.constant 21 : index
      %90 = memref.load %arg2[%c21] : memref<256xi32, #tpu.memory_space<smem>>
      %c21_i32 = arith.constant 21 : i32
      %91 = arith.cmpi sgt, %5, %c21_i32 : i32
      %92 = arith.extui %91 : i1 to i32
      %c0_i32_27 = arith.constant 0 : i32
      %93 = arith.cmpi ne, %92, %c0_i32_27 : i32
      scf.if %93 {
        %c21_i32_46 = arith.constant 21 : i32
        %c0_i32_47 = arith.constant 0 : i32
        %140 = tpu.memref_slice %arg4[%90, %c0_i32_47] : memref<512x128xf32, #tpu.memory_space<any>> -> memref<1x128xf32, #tpu.memory_space<any>>
        %c21_i32_48 = arith.constant 21 : i32
        %c0_i32_49 = arith.constant 0 : i32
        %141 = tpu.memref_slice %arg6[%c21_i32_48, %c0_i32_49] : memref<256x128xf32, #tpu.memory_space<vmem>> -> memref<1x128xf32, #tpu.memory_space<vmem>>
        %142 = tpu.memref_slice %arg7[%c21_i32_46] : memref<32x!tpu.dma_semaphore, #tpu.memory_space<semaphore_mem>> -> memref<1x!tpu.dma_semaphore, #tpu.memory_space<semaphore_mem>>
        %143 = tpu.memref_squeeze %142 : memref<1x!tpu.dma_semaphore, #tpu.memory_space<semaphore_mem>> -> memref<!tpu.dma_semaphore, #tpu.memory_space<semaphore_mem>>
        tpu.enqueue_dma source(%140 : memref<1x128xf32, #tpu.memory_space<any>>) target(%141 : memref<1x128xf32, #tpu.memory_space<vmem>>) target_semaphore(%143 : memref<!tpu.dma_semaphore, #tpu.memory_space<semaphore_mem>>)
      } else {
      }
      %c22 = arith.constant 22 : index
      %94 = memref.load %arg2[%c22] : memref<256xi32, #tpu.memory_space<smem>>
      %c22_i32 = arith.constant 22 : i32
      %95 = arith.cmpi sgt, %5, %c22_i32 : i32
      %96 = arith.extui %95 : i1 to i32
      %c0_i32_28 = arith.constant 0 : i32
      %97 = arith.cmpi ne, %96, %c0_i32_28 : i32
      scf.if %97 {
        %c22_i32_46 = arith.constant 22 : i32
        %c0_i32_47 = arith.constant 0 : i32
        %140 = tpu.memref_slice %arg4[%94, %c0_i32_47] : memref<512x128xf32, #tpu.memory_space<any>> -> memref<1x128xf32, #tpu.memory_space<any>>
        %c22_i32_48 = arith.constant 22 : i32
        %c0_i32_49 = arith.constant 0 : i32
        %141 = tpu.memref_slice %arg6[%c22_i32_48, %c0_i32_49] : memref<256x128xf32, #tpu.memory_space<vmem>> -> memref<1x128xf32, #tpu.memory_space<vmem>>
        %142 = tpu.memref_slice %arg7[%c22_i32_46] : memref<32x!tpu.dma_semaphore, #tpu.memory_space<semaphore_mem>> -> memref<1x!tpu.dma_semaphore, #tpu.memory_space<semaphore_mem>>
        %143 = tpu.memref_squeeze %142 : memref<1x!tpu.dma_semaphore, #tpu.memory_space<semaphore_mem>> -> memref<!tpu.dma_semaphore, #tpu.memory_space<semaphore_mem>>
        tpu.enqueue_dma source(%140 : memref<1x128xf32, #tpu.memory_space<any>>) target(%141 : memref<1x128xf32, #tpu.memory_space<vmem>>) target_semaphore(%143 : memref<!tpu.dma_semaphore, #tpu.memory_space<semaphore_mem>>)
      } else {
      }
      %c23 = arith.constant 23 : index
      %98 = memref.load %arg2[%c23] : memref<256xi32, #tpu.memory_space<smem>>
      %c23_i32 = arith.constant 23 : i32
      %99 = arith.cmpi sgt, %5, %c23_i32 : i32
      %100 = arith.extui %99 : i1 to i32
      %c0_i32_29 = arith.constant 0 : i32
      %101 = arith.cmpi ne, %100, %c0_i32_29 : i32
      scf.if %101 {
        %c23_i32_46 = arith.constant 23 : i32
        %c0_i32_47 = arith.constant 0 : i32
        %140 = tpu.memref_slice %arg4[%98, %c0_i32_47] : memref<512x128xf32, #tpu.memory_space<any>> -> memref<1x128xf32, #tpu.memory_space<any>>
        %c23_i32_48 = arith.constant 23 : i32
        %c0_i32_49 = arith.constant 0 : i32
        %141 = tpu.memref_slice %arg6[%c23_i32_48, %c0_i32_49] : memref<256x128xf32, #tpu.memory_space<vmem>> -> memref<1x128xf32, #tpu.memory_space<vmem>>
        %142 = tpu.memref_slice %arg7[%c23_i32_46] : memref<32x!tpu.dma_semaphore, #tpu.memory_space<semaphore_mem>> -> memref<1x!tpu.dma_semaphore, #tpu.memory_space<semaphore_mem>>
        %143 = tpu.memref_squeeze %142 : memref<1x!tpu.dma_semaphore, #tpu.memory_space<semaphore_mem>> -> memref<!tpu.dma_semaphore, #tpu.memory_space<semaphore_mem>>
        tpu.enqueue_dma source(%140 : memref<1x128xf32, #tpu.memory_space<any>>) target(%141 : memref<1x128xf32, #tpu.memory_space<vmem>>) target_semaphore(%143 : memref<!tpu.dma_semaphore, #tpu.memory_space<semaphore_mem>>)
      } else {
      }
      %c24 = arith.constant 24 : index
      %102 = memref.load %arg2[%c24] : memref<256xi32, #tpu.memory_space<smem>>
      %c24_i32 = arith.constant 24 : i32
      %103 = arith.cmpi sgt, %5, %c24_i32 : i32
      %104 = arith.extui %103 : i1 to i32
      %c0_i32_30 = arith.constant 0 : i32
      %105 = arith.cmpi ne, %104, %c0_i32_30 : i32
      scf.if %105 {
        %c24_i32_46 = arith.constant 24 : i32
        %c0_i32_47 = arith.constant 0 : i32
        %140 = tpu.memref_slice %arg4[%102, %c0_i32_47] : memref<512x128xf32, #tpu.memory_space<any>> -> memref<1x128xf32, #tpu.memory_space<any>>
        %c24_i32_48 = arith.constant 24 : i32
        %c0_i32_49 = arith.constant 0 : i32
        %141 = tpu.memref_slice %arg6[%c24_i32_48, %c0_i32_49] : memref<256x128xf32, #tpu.memory_space<vmem>> -> memref<1x128xf32, #tpu.memory_space<vmem>>
        %142 = tpu.memref_slice %arg7[%c24_i32_46] : memref<32x!tpu.dma_semaphore, #tpu.memory_space<semaphore_mem>> -> memref<1x!tpu.dma_semaphore, #tpu.memory_space<semaphore_mem>>
        %143 = tpu.memref_squeeze %142 : memref<1x!tpu.dma_semaphore, #tpu.memory_space<semaphore_mem>> -> memref<!tpu.dma_semaphore, #tpu.memory_space<semaphore_mem>>
        tpu.enqueue_dma source(%140 : memref<1x128xf32, #tpu.memory_space<any>>) target(%141 : memref<1x128xf32, #tpu.memory_space<vmem>>) target_semaphore(%143 : memref<!tpu.dma_semaphore, #tpu.memory_space<semaphore_mem>>)
      } else {
      }
      %c25 = arith.constant 25 : index
      %106 = memref.load %arg2[%c25] : memref<256xi32, #tpu.memory_space<smem>>
      %c25_i32 = arith.constant 25 : i32
      %107 = arith.cmpi sgt, %5, %c25_i32 : i32
      %108 = arith.extui %107 : i1 to i32
      %c0_i32_31 = arith.constant 0 : i32
      %109 = arith.cmpi ne, %108, %c0_i32_31 : i32
      scf.if %109 {
        %c25_i32_46 = arith.constant 25 : i32
        %c0_i32_47 = arith.constant 0 : i32
        %140 = tpu.memref_slice %arg4[%106, %c0_i32_47] : memref<512x128xf32, #tpu.memory_space<any>> -> memref<1x128xf32, #tpu.memory_space<any>>
        %c25_i32_48 = arith.constant 25 : i32
        %c0_i32_49 = arith.constant 0 : i32
        %141 = tpu.memref_slice %arg6[%c25_i32_48, %c0_i32_49] : memref<256x128xf32, #tpu.memory_space<vmem>> -> memref<1x128xf32, #tpu.memory_space<vmem>>
        %142 = tpu.memref_slice %arg7[%c25_i32_46] : memref<32x!tpu.dma_semaphore, #tpu.memory_space<semaphore_mem>> -> memref<1x!tpu.dma_semaphore, #tpu.memory_space<semaphore_mem>>
        %143 = tpu.memref_squeeze %142 : memref<1x!tpu.dma_semaphore, #tpu.memory_space<semaphore_mem>> -> memref<!tpu.dma_semaphore, #tpu.memory_space<semaphore_mem>>
        tpu.enqueue_dma source(%140 : memref<1x128xf32, #tpu.memory_space<any>>) target(%141 : memref<1x128xf32, #tpu.memory_space<vmem>>) target_semaphore(%143 : memref<!tpu.dma_semaphore, #tpu.memory_space<semaphore_mem>>)
      } else {
      }
      %c26 = arith.constant 26 : index
      %110 = memref.load %arg2[%c26] : memref<256xi32, #tpu.memory_space<smem>>
      %c26_i32 = arith.constant 26 : i32
      %111 = arith.cmpi sgt, %5, %c26_i32 : i32
      %112 = arith.extui %111 : i1 to i32
      %c0_i32_32 = arith.constant 0 : i32
      %113 = arith.cmpi ne, %112, %c0_i32_32 : i32
      scf.if %113 {
        %c26_i32_46 = arith.constant 26 : i32
        %c0_i32_47 = arith.constant 0 : i32
        %140 = tpu.memref_slice %arg4[%110, %c0_i32_47] : memref<512x128xf32, #tpu.memory_space<any>> -> memref<1x128xf32, #tpu.memory_space<any>>
        %c26_i32_48 = arith.constant 26 : i32
        %c0_i32_49 = arith.constant 0 : i32
        %141 = tpu.memref_slice %arg6[%c26_i32_48, %c0_i32_49] : memref<256x128xf32, #tpu.memory_space<vmem>> -> memref<1x128xf32, #tpu.memory_space<vmem>>
        %142 = tpu.memref_slice %arg7[%c26_i32_46] : memref<32x!tpu.dma_semaphore, #tpu.memory_space<semaphore_mem>> -> memref<1x!tpu.dma_semaphore, #tpu.memory_space<semaphore_mem>>
        %143 = tpu.memref_squeeze %142 : memref<1x!tpu.dma_semaphore, #tpu.memory_space<semaphore_mem>> -> memref<!tpu.dma_semaphore, #tpu.memory_space<semaphore_mem>>
        tpu.enqueue_dma source(%140 : memref<1x128xf32, #tpu.memory_space<any>>) target(%141 : memref<1x128xf32, #tpu.memory_space<vmem>>) target_semaphore(%143 : memref<!tpu.dma_semaphore, #tpu.memory_space<semaphore_mem>>)
      } else {
      }
      %c27 = arith.constant 27 : index
      %114 = memref.load %arg2[%c27] : memref<256xi32, #tpu.memory_space<smem>>
      %c27_i32 = arith.constant 27 : i32
      %115 = arith.cmpi sgt, %5, %c27_i32 : i32
      %116 = arith.extui %115 : i1 to i32
      %c0_i32_33 = arith.constant 0 : i32
      %117 = arith.cmpi ne, %116, %c0_i32_33 : i32
      scf.if %117 {
        %c27_i32_46 = arith.constant 27 : i32
        %c0_i32_47 = arith.constant 0 : i32
        %140 = tpu.memref_slice %arg4[%114, %c0_i32_47] : memref<512x128xf32, #tpu.memory_space<any>> -> memref<1x128xf32, #tpu.memory_space<any>>
        %c27_i32_48 = arith.constant 27 : i32
        %c0_i32_49 = arith.constant 0 : i32
        %141 = tpu.memref_slice %arg6[%c27_i32_48, %c0_i32_49] : memref<256x128xf32, #tpu.memory_space<vmem>> -> memref<1x128xf32, #tpu.memory_space<vmem>>
        %142 = tpu.memref_slice %arg7[%c27_i32_46] : memref<32x!tpu.dma_semaphore, #tpu.memory_space<semaphore_mem>> -> memref<1x!tpu.dma_semaphore, #tpu.memory_space<semaphore_mem>>
        %143 = tpu.memref_squeeze %142 : memref<1x!tpu.dma_semaphore, #tpu.memory_space<semaphore_mem>> -> memref<!tpu.dma_semaphore, #tpu.memory_space<semaphore_mem>>
        tpu.enqueue_dma source(%140 : memref<1x128xf32, #tpu.memory_space<any>>) target(%141 : memref<1x128xf32, #tpu.memory_space<vmem>>) target_semaphore(%143 : memref<!tpu.dma_semaphore, #tpu.memory_space<semaphore_mem>>)
      } else {
      }
      %c28 = arith.constant 28 : index
      %118 = memref.load %arg2[%c28] : memref<256xi32, #tpu.memory_space<smem>>
      %c28_i32 = arith.constant 28 : i32
      %119 = arith.cmpi sgt, %5, %c28_i32 : i32
      %120 = arith.extui %119 : i1 to i32
      %c0_i32_34 = arith.constant 0 : i32
      %121 = arith.cmpi ne, %120, %c0_i32_34 : i32
      scf.if %121 {
        %c28_i32_46 = arith.constant 28 : i32
        %c0_i32_47 = arith.constant 0 : i32
        %140 = tpu.memref_slice %arg4[%118, %c0_i32_47] : memref<512x128xf32, #tpu.memory_space<any>> -> memref<1x128xf32, #tpu.memory_space<any>>
        %c28_i32_48 = arith.constant 28 : i32
        %c0_i32_49 = arith.constant 0 : i32
        %141 = tpu.memref_slice %arg6[%c28_i32_48, %c0_i32_49] : memref<256x128xf32, #tpu.memory_space<vmem>> -> memref<1x128xf32, #tpu.memory_space<vmem>>
        %142 = tpu.memref_slice %arg7[%c28_i32_46] : memref<32x!tpu.dma_semaphore, #tpu.memory_space<semaphore_mem>> -> memref<1x!tpu.dma_semaphore, #tpu.memory_space<semaphore_mem>>
        %143 = tpu.memref_squeeze %142 : memref<1x!tpu.dma_semaphore, #tpu.memory_space<semaphore_mem>> -> memref<!tpu.dma_semaphore, #tpu.memory_space<semaphore_mem>>
        tpu.enqueue_dma source(%140 : memref<1x128xf32, #tpu.memory_space<any>>) target(%141 : memref<1x128xf32, #tpu.memory_space<vmem>>) target_semaphore(%143 : memref<!tpu.dma_semaphore, #tpu.memory_space<semaphore_mem>>)
      } else {
      }
      %c29 = arith.constant 29 : index
      %122 = memref.load %arg2[%c29] : memref<256xi32, #tpu.memory_space<smem>>
      %c29_i32 = arith.constant 29 : i32
      %123 = arith.cmpi sgt, %5, %c29_i32 : i32
      %124 = arith.extui %123 : i1 to i32
      %c0_i32_35 = arith.constant 0 : i32
      %125 = arith.cmpi ne, %124, %c0_i32_35 : i32
      scf.if %125 {
        %c29_i32_46 = arith.constant 29 : i32
        %c0_i32_47 = arith.constant 0 : i32
        %140 = tpu.memref_slice %arg4[%122, %c0_i32_47] : memref<512x128xf32, #tpu.memory_space<any>> -> memref<1x128xf32, #tpu.memory_space<any>>
        %c29_i32_48 = arith.constant 29 : i32
        %c0_i32_49 = arith.constant 0 : i32
        %141 = tpu.memref_slice %arg6[%c29_i32_48, %c0_i32_49] : memref<256x128xf32, #tpu.memory_space<vmem>> -> memref<1x128xf32, #tpu.memory_space<vmem>>
        %142 = tpu.memref_slice %arg7[%c29_i32_46] : memref<32x!tpu.dma_semaphore, #tpu.memory_space<semaphore_mem>> -> memref<1x!tpu.dma_semaphore, #tpu.memory_space<semaphore_mem>>
        %143 = tpu.memref_squeeze %142 : memref<1x!tpu.dma_semaphore, #tpu.memory_space<semaphore_mem>> -> memref<!tpu.dma_semaphore, #tpu.memory_space<semaphore_mem>>
        tpu.enqueue_dma source(%140 : memref<1x128xf32, #tpu.memory_space<any>>) target(%141 : memref<1x128xf32, #tpu.memory_space<vmem>>) target_semaphore(%143 : memref<!tpu.dma_semaphore, #tpu.memory_space<semaphore_mem>>)
      } else {
      }
      %c30 = arith.constant 30 : index
      %126 = memref.load %arg2[%c30] : memref<256xi32, #tpu.memory_space<smem>>
      %c30_i32 = arith.constant 30 : i32
      %127 = arith.cmpi sgt, %5, %c30_i32 : i32
      %128 = arith.extui %127 : i1 to i32
      %c0_i32_36 = arith.constant 0 : i32
      %129 = arith.cmpi ne, %128, %c0_i32_36 : i32
      scf.if %129 {
        %c30_i32_46 = arith.constant 30 : i32
        %c0_i32_47 = arith.constant 0 : i32
        %140 = tpu.memref_slice %arg4[%126, %c0_i32_47] : memref<512x128xf32, #tpu.memory_space<any>> -> memref<1x128xf32, #tpu.memory_space<any>>
        %c30_i32_48 = arith.constant 30 : i32
        %c0_i32_49 = arith.constant 0 : i32
        %141 = tpu.memref_slice %arg6[%c30_i32_48, %c0_i32_49] : memref<256x128xf32, #tpu.memory_space<vmem>> -> memref<1x128xf32, #tpu.memory_space<vmem>>
        %142 = tpu.memref_slice %arg7[%c30_i32_46] : memref<32x!tpu.dma_semaphore, #tpu.memory_space<semaphore_mem>> -> memref<1x!tpu.dma_semaphore, #tpu.memory_space<semaphore_mem>>
        %143 = tpu.memref_squeeze %142 : memref<1x!tpu.dma_semaphore, #tpu.memory_space<semaphore_mem>> -> memref<!tpu.dma_semaphore, #tpu.memory_space<semaphore_mem>>
        tpu.enqueue_dma source(%140 : memref<1x128xf32, #tpu.memory_space<any>>) target(%141 : memref<1x128xf32, #tpu.memory_space<vmem>>) target_semaphore(%143 : memref<!tpu.dma_semaphore, #tpu.memory_space<semaphore_mem>>)
      } else {
      }
      %c31 = arith.constant 31 : index
      %130 = memref.load %arg2[%c31] : memref<256xi32, #tpu.memory_space<smem>>
      %c31_i32 = arith.constant 31 : i32
      %131 = arith.cmpi sgt, %5, %c31_i32 : i32
      %132 = arith.extui %131 : i1 to i32
      %c0_i32_37 = arith.constant 0 : i32
      %133 = arith.cmpi ne, %132, %c0_i32_37 : i32
      scf.if %133 {
        %c31_i32_46 = arith.constant 31 : i32
        %c0_i32_47 = arith.constant 0 : i32
        %140 = tpu.memref_slice %arg4[%130, %c0_i32_47] : memref<512x128xf32, #tpu.memory_space<any>> -> memref<1x128xf32, #tpu.memory_space<any>>
        %c31_i32_48 = arith.constant 31 : i32
        %c0_i32_49 = arith.constant 0 : i32
        %141 = tpu.memref_slice %arg6[%c31_i32_48, %c0_i32_49] : memref<256x128xf32, #tpu.memory_space<vmem>> -> memref<1x128xf32, #tpu.memory_space<vmem>>
        %142 = tpu.memref_slice %arg7[%c31_i32_46] : memref<32x!tpu.dma_semaphore, #tpu.memory_space<semaphore_mem>> -> memref<1x!tpu.dma_semaphore, #tpu.memory_space<semaphore_mem>>
        %143 = tpu.memref_squeeze %142 : memref<1x!tpu.dma_semaphore, #tpu.memory_space<semaphore_mem>> -> memref<!tpu.dma_semaphore, #tpu.memory_space<semaphore_mem>>
        tpu.enqueue_dma source(%140 : memref<1x128xf32, #tpu.memory_space<any>>) target(%141 : memref<1x128xf32, #tpu.memory_space<vmem>>) target_semaphore(%143 : memref<!tpu.dma_semaphore, #tpu.memory_space<semaphore_mem>>)
      } else {
      }
      %c0_i32_38 = arith.constant 0 : i32
      %134 = arith.subi %5, %c0_i32_38 : i32
      %c1_i32_39 = arith.constant 1 : i32
      %c1_i32_40 = arith.constant 1 : i32
      %135 = arith.subi %c1_i32_39, %c1_i32_40 : i32
      %136 = arith.addi %134, %135 : i32
      %c1_i32_41 = arith.constant 1 : i32
      %137 = arith.divsi %136, %c1_i32_41 : i32
      %c1_i32_42 = arith.constant 1 : i32
      %c0_i32_43 = arith.constant 0 : i32
      %c0_i32_44 = arith.constant 0 : i32
      %138 = arith.subi %137, %c0_i32_44 : i32
      %139 = arith.addi %c0_i32_44, %138 : i32
      %c1_i32_45 = arith.constant 1 : i32
      scf.for %arg8 = %c0_i32_44 to %139 step %c1_i32_45  : i32 {
        %140 = arith.muli %arg8, %c1_i32_42 : i32
        %141 = arith.addi %c0_i32_43, %140 : i32
        %c31_i32_46 = arith.constant 31 : i32
        %142 = arith.andi %141, %c31_i32_46 : i32
        %c32_i32_47 = arith.constant 32 : i32
        %143 = arith.addi %141, %c32_i32_47 : i32
        %c255_i32 = arith.constant 255 : i32
        %144 = arith.minsi %143, %c255_i32 : i32
        %145 = arith.index_cast %144 : i32 to index
        %146 = memref.load %arg2[%145] : memref<256xi32, #tpu.memory_space<smem>>
        %c0_i32_48 = arith.constant 0 : i32
        %c0_i32_49 = arith.constant 0 : i32
        %147 = tpu.memref_slice %arg4[%c0_i32_48, %c0_i32_49] : memref<512x128xf32, #tpu.memory_space<any>> -> memref<1x128xf32, #tpu.memory_space<any>>
        %c0_i32_50 = arith.constant 0 : i32
        %c0_i32_51 = arith.constant 0 : i32
        %148 = tpu.memref_slice %arg6[%c0_i32_50, %c0_i32_51] : memref<256x128xf32, #tpu.memory_space<vmem>> -> memref<1x128xf32, #tpu.memory_space<vmem>>
        %149 = tpu.memref_slice %arg7[%142] : memref<32x!tpu.dma_semaphore, #tpu.memory_space<semaphore_mem>> -> memref<1x!tpu.dma_semaphore, #tpu.memory_space<semaphore_mem>>
        %150 = tpu.memref_squeeze %149 : memref<1x!tpu.dma_semaphore, #tpu.memory_space<semaphore_mem>> -> memref<!tpu.dma_semaphore, #tpu.memory_space<semaphore_mem>>
        tpu.wait_dma2 semaphore(%150 : memref<!tpu.dma_semaphore, #tpu.memory_space<semaphore_mem>>) src(%147 : memref<1x128xf32, #tpu.memory_space<any>>) dst(%148 : memref<1x128xf32, #tpu.memory_space<vmem>>)
        %c32_i32_52 = arith.constant 32 : i32
        %151 = arith.addi %141, %c32_i32_52 : i32
        %152 = arith.cmpi slt, %151, %5 : i32
        %153 = arith.extui %152 : i1 to i32
        %c0_i32_53 = arith.constant 0 : i32
        %154 = arith.cmpi ne, %153, %c0_i32_53 : i32
        scf.if %154 {
          %c32_i32_54 = arith.constant 32 : i32
          %155 = arith.addi %141, %c32_i32_54 : i32
          %c0_i32_55 = arith.constant 0 : i32
          %156 = tpu.memref_slice %arg4[%146, %c0_i32_55] : memref<512x128xf32, #tpu.memory_space<any>> -> memref<1x128xf32, #tpu.memory_space<any>>
          %c0_i32_56 = arith.constant 0 : i32
          %157 = tpu.memref_slice %arg6[%155, %c0_i32_56] : memref<256x128xf32, #tpu.memory_space<vmem>> -> memref<1x128xf32, #tpu.memory_space<vmem>>
          %158 = tpu.memref_slice %arg7[%142] : memref<32x!tpu.dma_semaphore, #tpu.memory_space<semaphore_mem>> -> memref<1x!tpu.dma_semaphore, #tpu.memory_space<semaphore_mem>>
          %159 = tpu.memref_squeeze %158 : memref<1x!tpu.dma_semaphore, #tpu.memory_space<semaphore_mem>> -> memref<!tpu.dma_semaphore, #tpu.memory_space<semaphore_mem>>
          tpu.enqueue_dma source(%156 : memref<1x128xf32, #tpu.memory_space<any>>) target(%157 : memref<1x128xf32, #tpu.memory_space<vmem>>) target_semaphore(%159 : memref<!tpu.dma_semaphore, #tpu.memory_space<semaphore_mem>>)
        } else {
        }
      }
    } else {
    }
    %c256_i32 = arith.constant 256 : i32
    %3 = arith.muli %arg0, %c256_i32 : i32
    %c0_i32_1 = arith.constant 0 : i32
    %c32_i32 = arith.constant 32 : i32
    %4 = arith.addi %c0_i32_1, %c32_i32 : i32
    %c1_i32 = arith.constant 1 : i32
    scf.for %arg8 = %c0_i32_1 to %4 step %c1_i32  : i32 {
      %c8_i32 = arith.constant 8 : i32
      %5 = arith.muli %arg8, %c8_i32 : i32
      %6 = tpu.assume_multiple %5, 8 : i32
      %7 = arith.addi %3, %6 : i32
      %c0_i32_3 = arith.constant 0 : i32
      %8 = arith.addi %7, %c0_i32_3 : i32
      %9 = arith.index_cast %8 : i32 to index
      %10 = memref.load %arg3[%9] : memref<256xi32, #tpu.memory_space<smem>>
      %11 = arith.index_cast %10 : i32 to index
      %c0 = arith.constant 0 : index
      %12 = vector.load %arg6[%11, %c0] : memref<256x128xf32, #tpu.memory_space<vmem>>, vector<1x128xf32>
      %c0_i32_4 = arith.constant 0 : i32
      %13 = arith.addi %6, %c0_i32_4 : i32
      %14 = arith.index_cast %13 : i32 to index
      %c0_5 = arith.constant 0 : index
      %15 = vector.load %arg5[%14, %c0_5] : memref<256x128xf32, #tpu.memory_space<vmem>>, vector<1x128xf32>
      tpu.vector_store %arg5[%14, %c0_5], %12 {strides = array<i32>} : memref<256x128xf32, #tpu.memory_space<vmem>>, vector<1x128xf32>,
      %c1_i32_6 = arith.constant 1 : i32
      %16 = arith.addi %7, %c1_i32_6 : i32
      %17 = arith.index_cast %16 : i32 to index
      %18 = memref.load %arg3[%17] : memref<256xi32, #tpu.memory_space<smem>>
      %19 = arith.index_cast %18 : i32 to index
      %c0_7 = arith.constant 0 : index
      %20 = vector.load %arg6[%19, %c0_7] : memref<256x128xf32, #tpu.memory_space<vmem>>, vector<1x128xf32>
      %c1_i32_8 = arith.constant 1 : i32
      %21 = arith.addi %6, %c1_i32_8 : i32
      %22 = arith.index_cast %21 : i32 to index
      %c0_9 = arith.constant 0 : index
      %23 = vector.load %arg5[%22, %c0_9] : memref<256x128xf32, #tpu.memory_space<vmem>>, vector<1x128xf32>
      tpu.vector_store %arg5[%22, %c0_9], %20 {strides = array<i32>} : memref<256x128xf32, #tpu.memory_space<vmem>>, vector<1x128xf32>,
      %c2_i32 = arith.constant 2 : i32
      %24 = arith.addi %7, %c2_i32 : i32
      %25 = arith.index_cast %24 : i32 to index
      %26 = memref.load %arg3[%25] : memref<256xi32, #tpu.memory_space<smem>>
      %27 = arith.index_cast %26 : i32 to index
      %c0_10 = arith.constant 0 : index
      %28 = vector.load %arg6[%27, %c0_10] : memref<256x128xf32, #tpu.memory_space<vmem>>, vector<1x128xf32>
      %c2_i32_11 = arith.constant 2 : i32
      %29 = arith.addi %6, %c2_i32_11 : i32
      %30 = arith.index_cast %29 : i32 to index
      %c0_12 = arith.constant 0 : index
      %31 = vector.load %arg5[%30, %c0_12] : memref<256x128xf32, #tpu.memory_space<vmem>>, vector<1x128xf32>
      tpu.vector_store %arg5[%30, %c0_12], %28 {strides = array<i32>} : memref<256x128xf32, #tpu.memory_space<vmem>>, vector<1x128xf32>,
      %c3_i32 = arith.constant 3 : i32
      %32 = arith.addi %7, %c3_i32 : i32
      %33 = arith.index_cast %32 : i32 to index
      %34 = memref.load %arg3[%33] : memref<256xi32, #tpu.memory_space<smem>>
      %35 = arith.index_cast %34 : i32 to index
      %c0_13 = arith.constant 0 : index
      %36 = vector.load %arg6[%35, %c0_13] : memref<256x128xf32, #tpu.memory_space<vmem>>, vector<1x128xf32>
      %c3_i32_14 = arith.constant 3 : i32
      %37 = arith.addi %6, %c3_i32_14 : i32
      %38 = arith.index_cast %37 : i32 to index
      %c0_15 = arith.constant 0 : index
      %39 = vector.load %arg5[%38, %c0_15] : memref<256x128xf32, #tpu.memory_space<vmem>>, vector<1x128xf32>
      tpu.vector_store %arg5[%38, %c0_15], %36 {strides = array<i32>} : memref<256x128xf32, #tpu.memory_space<vmem>>, vector<1x128xf32>,
      %c4_i32 = arith.constant 4 : i32
      %40 = arith.addi %7, %c4_i32 : i32
      %41 = arith.index_cast %40 : i32 to index
      %42 = memref.load %arg3[%41] : memref<256xi32, #tpu.memory_space<smem>>
      %43 = arith.index_cast %42 : i32 to index
      %c0_16 = arith.constant 0 : index
      %44 = vector.load %arg6[%43, %c0_16] : memref<256x128xf32, #tpu.memory_space<vmem>>, vector<1x128xf32>
      %c4_i32_17 = arith.constant 4 : i32
      %45 = arith.addi %6, %c4_i32_17 : i32
      %46 = arith.index_cast %45 : i32 to index
      %c0_18 = arith.constant 0 : index
      %47 = vector.load %arg5[%46, %c0_18] : memref<256x128xf32, #tpu.memory_space<vmem>>, vector<1x128xf32>
      tpu.vector_store %arg5[%46, %c0_18], %44 {strides = array<i32>} : memref<256x128xf32, #tpu.memory_space<vmem>>, vector<1x128xf32>,
      %c5_i32 = arith.constant 5 : i32
      %48 = arith.addi %7, %c5_i32 : i32
      %49 = arith.index_cast %48 : i32 to index
      %50 = memref.load %arg3[%49] : memref<256xi32, #tpu.memory_space<smem>>
      %51 = arith.index_cast %50 : i32 to index
      %c0_19 = arith.constant 0 : index
      %52 = vector.load %arg6[%51, %c0_19] : memref<256x128xf32, #tpu.memory_space<vmem>>, vector<1x128xf32>
      %c5_i32_20 = arith.constant 5 : i32
      %53 = arith.addi %6, %c5_i32_20 : i32
      %54 = arith.index_cast %53 : i32 to index
      %c0_21 = arith.constant 0 : index
      %55 = vector.load %arg5[%54, %c0_21] : memref<256x128xf32, #tpu.memory_space<vmem>>, vector<1x128xf32>
      tpu.vector_store %arg5[%54, %c0_21], %52 {strides = array<i32>} : memref<256x128xf32, #tpu.memory_space<vmem>>, vector<1x128xf32>,
      %c6_i32 = arith.constant 6 : i32
      %56 = arith.addi %7, %c6_i32 : i32
      %57 = arith.index_cast %56 : i32 to index
      %58 = memref.load %arg3[%57] : memref<256xi32, #tpu.memory_space<smem>>
      %59 = arith.index_cast %58 : i32 to index
      %c0_22 = arith.constant 0 : index
      %60 = vector.load %arg6[%59, %c0_22] : memref<256x128xf32, #tpu.memory_space<vmem>>, vector<1x128xf32>
      %c6_i32_23 = arith.constant 6 : i32
      %61 = arith.addi %6, %c6_i32_23 : i32
      %62 = arith.index_cast %61 : i32 to index
      %c0_24 = arith.constant 0 : index
      %63 = vector.load %arg5[%62, %c0_24] : memref<256x128xf32, #tpu.memory_space<vmem>>, vector<1x128xf32>
      tpu.vector_store %arg5[%62, %c0_24], %60 {strides = array<i32>} : memref<256x128xf32, #tpu.memory_space<vmem>>, vector<1x128xf32>,
      %c7_i32 = arith.constant 7 : i32
      %64 = arith.addi %7, %c7_i32 : i32
      %65 = arith.index_cast %64 : i32 to index
      %66 = memref.load %arg3[%65] : memref<256xi32, #tpu.memory_space<smem>>
      %67 = arith.index_cast %66 : i32 to index
      %c0_25 = arith.constant 0 : index
      %68 = vector.load %arg6[%67, %c0_25] : memref<256x128xf32, #tpu.memory_space<vmem>>, vector<1x128xf32>
      %c7_i32_26 = arith.constant 7 : i32
      %69 = arith.addi %6, %c7_i32_26 : i32
      %70 = arith.index_cast %69 : i32 to index
      %c0_27 = arith.constant 0 : index
      %71 = vector.load %arg5[%70, %c0_27] : memref<256x128xf32, #tpu.memory_space<vmem>>, vector<1x128xf32>
      tpu.vector_store %arg5[%70, %c0_27], %68 {strides = array<i32>} : memref<256x128xf32, #tpu.memory_space<vmem>>, vector<1x128xf32>,
    }
    %c32_i32_2 = arith.constant 32 : i32
    return
  }
  func.func @transform_1(%arg0: i32, %arg1: memref<1xi32, #tpu.memory_space<smem>>, %arg2: memref<256xi32, #tpu.memory_space<smem>>, %arg3: memref<256xi32, #tpu.memory_space<smem>>) -> (i32, i32) {
    %c0_i32 = arith.constant 0 : i32
    %c0_i32_0 = arith.constant 0 : i32
    return %arg0, %c0_i32 : i32, i32
  }
}

</mosaic_0001>

<bundles_post_ra>
// kernel: tpu_custom_call.1
= control target key start
LH: loop header
LB: loop body
LE: loop exit
PB: predicated region body
PF: predicated region fallthrough
CT: control target
= control target key end

     0   :  { %s2372_s21 = smov [#allocation6]   ;;  %s2373_s22 = smov [#allocation7]   ;;  %s3136_s0 = inlined_call_operand.<no memory space> [shape: s32[1], index: 0, kind: input, shape index: {}]   ;;  %s3137_s1 = inlined_call_operand.vmem [shape: s32[256], index: 1, kind: input, shape index: {}]   ;;  %s3138_s3 = inlined_call_operand.hbm [shape: f32[512,128], index: 3, kind: input, shape index: {}]   ;;  %s3139_s4 = inlined_call_operand.hbm [shape: f32[256,128], index: 4, kind: output, shape index: {}]   ;;  %s3140_s2 = inlined_call_operand.hbm [shape: s32[256], index: 2, kind: input, shape index: {}]  }
   0x1   :  { %s11_s17 = sshll.u32 %s3137_s1, 4  ;;  %s16_s20 = sshll.u32 %s3140_s2, 4  ;;  %s12_s17 = int_to_ptr.vmem [resolvable:$true] %s11_s17  ;;  %s17_s20 = int_to_ptr.hbm [resolvable:$true] %s16_s20 }
   0x2   :  { %14 = dma.vmem_to_smem %s12_s17, 32, %s2372_s21, [#allocation4] }
   0x3   :  { %19 = dma.hbm_to_smem %s17_s20, 32, %s2373_s22, [#allocation4] }
   0x4   :  { %2358 = dma.done.wait [#allocation4], 64 }
   0x5   :  { %2359 = vsyncadd [#allocation4], 4294967232 }
   0x6   :  { %22 = sfence }
   0x7   :  { %23 = vsyncpa [#allocation9], 0  ;;  %s29_s23 = sld [smem:[#allocation6]]  ;;  %p1114_p0 = scmp.le.s32.totalorder %s3136_s0, 0 }
   0x8   :  { %p1292_p1 = scmp.gt.s32.totalorder %s3136_s0, 0  ;;  %s2374_s2 = smov [#allocation2]  }
   0x9   :  { %s44_s27 = sshll.u32 %s2374_s2, 4  ;;  %s1115_s28 = sld [smem:[#allocation6 + $0x1]]  ;;  %s45_s27 = int_to_ptr.vmem [resolvable:$true] %s44_s27 }
   0xa   :  { %p1293_p2 = scmp.gt.s32.totalorder %s3136_s0, 1  ;;  %s2375_s5 = smov [#allocation2 + $0x1]  }
   0xb   :  { %s2450_s6 = sshll.u32 %s2375_s5, 4  ;;  %s2452_s7 = sld [smem:[#allocation6 + $0x2]]  ;;  %s66_s6 = int_to_ptr.vmem [resolvable:$true] %s2450_s6 }
   0xc   :  { %s2468_s21 = scalar_lea.hbm %s3138_s3, 512 }
   0xd   :  { %s34_s10 = scalar_lea.hbm %s3138_s3, %s29_s23 }
   0xe   :  { %s42_s11 = sshll.u32 %s34_s10, 4  ;;  %s43_s11 = int_to_ptr.hbm [resolvable:$true] %s42_s11 }
   0xf   :  { %s53_s14 = scalar_lea.hbm %s3138_s3, %s1115_s28  ;;  %s1402_s15 = sshra.s32 %s43_s11, 4  ;;  %s1403_s15 = int_to_ptr.hbm [resolvable:$true] %s1402_s15 }
  0x10   :  { %s1404_s16 = scalar_lea.hbm %s1403_s15, 1  ;;  %p1409_p6 = scmp.lt.s32.totalorder %s1403_s15, %s3138_s3 }
  0x11   :  { %p1405_p3 = scmp.ne.s32.totalorder %s1403_s15, %s1404_s16  ;;  %p1410_p7 = scmp.lt.s32.totalorder %s2468_s21, %s1404_s16 }
  0x13   :  { %p1406_p4 = pnand %p1405_p3, %p1292_p1  ;;  %p1411_p8 = por %p1410_p7, %p1409_p6 }
  0x15   :  { %p1407_p5 = pneg %p1406_p4 }
  0x17   :  { %p1412_p9 = pnand %p1411_p8, %p1407_p5 }
  0x19   :  { %1415 = shalt.err (!%p1412_p9)  }
  0x1a   :  { %1227 = dma.hbm_to_vmem [thread:$0]  (%p1292_p1), %s43_s11, 16, %s45_s27, [#allocation3] }
  0x1b   :  { %s63_s1 = sshll.u32 %s53_s14, 4  ;;  %p1294_p10 = scmp.gt.s32.totalorder %s3136_s0, 2  ;;  %s64_s1 = int_to_ptr.hbm [resolvable:$true] %s63_s1 }
  0x1c   :  { %s74_s30 = scalar_lea.hbm %s3138_s3, %s2452_s7  ;;  %s1430_s5 = sshra.s32 %s64_s1, 4  ;;  %s1431_s5 = int_to_ptr.hbm [resolvable:$true] %s1430_s5 }
  0x1d   :  { %s1432_s8 = scalar_lea.hbm %s1431_s5, 1  ;;  %p1437_p1 = scmp.lt.s32.totalorder %s1431_s5, %s3138_s3 }
  0x1e   :  { %p1433_p11 = scmp.ne.s32.totalorder %s1431_s5, %s1432_s8  ;;  %p1438_p3 = scmp.lt.s32.totalorder %s2468_s21, %s1432_s8 }
  0x20   :  { %p1434_p12 = pnand %p1433_p11, %p1293_p2  ;;  %p1439_p4 = por %p1438_p3, %p1437_p1 }
  0x22   :  { %p1435_p13 = pneg %p1434_p12 }
  0x24   :  { %p1440_p5 = pnand %p1439_p4, %p1435_p13 }
  0x26   :  { %1443 = shalt.err (!%p1440_p5)  }
  0x27   :  { %1229 = dma.hbm_to_vmem [thread:$0]  (%p1293_p2), %s64_s1, 16, %s66_s6, [#allocation3 + $0x1] }
  0x28   :  { %s84_s13 = sshll.u32 %s74_s30, 4  ;;  %s2376_s14 = smov [#allocation2 + $0x2]   ;;  %s85_s13 = int_to_ptr.hbm [resolvable:$true] %s84_s13 }
  0x29   :  { %s86_s15 = sshll.u32 %s2376_s14, 4  ;;  %s1119_s16 = sld [smem:[#allocation6 + $0x3]]  ;;  %s87_s15 = int_to_ptr.vmem [resolvable:$true] %s86_s15 }
  0x2a   :  { %s1458_s17 = sshra.s32 %s85_s13, 4  ;;  %s1459_s17 = int_to_ptr.hbm [resolvable:$true] %s1458_s17 }
  0x2b   :  { %s1460_s18 = scalar_lea.hbm %s1459_s17, 1  ;;  %p1465_p2 = scmp.lt.s32.totalorder %s1459_s17, %s3138_s3 }
  0x2c   :  { %p1461_p6 = scmp.ne.s32.totalorder %s1459_s17, %s1460_s18  ;;  %p1466_p9 = scmp.lt.s32.totalorder %s2468_s21, %s1460_s18 }
  0x2e   :  { %p1462_p7 = pnand %p1461_p6, %p1294_p10  ;;  %p1467_p11 = por %p1466_p9, %p1465_p2 }
  0x30   :  { %p1463_p8 = pneg %p1462_p7 }
  0x32   :  { %p1468_p12 = pnand %p1467_p11, %p1463_p8 }
  0x34   :  { %1471 = shalt.err (!%p1468_p12)  }
  0x35   :  { %1231 = dma.hbm_to_vmem [thread:$0]  (%p1294_p10), %s85_s13, 16, %s87_s15, [#allocation3 + $0x2] }
  0x36   :  { %p1295_p13 = scmp.gt.s32.totalorder %s3136_s0, 3  ;;  %s1121_s26 = sld [smem:[#allocation6 + $0x4]] }
  0x37   :  { %s2377_s2 = smov [#allocation2 + $0x3]   ;;  %p1296_p1 = scmp.gt.s32.totalorder %s3136_s0, 4 }
  0x38   :  { %s107_s28 = sshll.u32 %s2377_s2, 4  ;;  %s95_s9 = scalar_lea.hbm %s3138_s3, %s1119_s16  ;;  %s108_s28 = int_to_ptr.vmem [resolvable:$true] %s107_s28 }
  0x39   :  { %s105_s10 = sshll.u32 %s95_s9, 4  ;;  %s2378_s27 = smov [#allocation2 + $0x4]   ;;  %s106_s10 = int_to_ptr.hbm [resolvable:$true] %s105_s10 }
  0x3a   :  { %s2520_s11 = sshll.u32 %s2378_s27, 4  ;;  %s1486_s12 = sshra.s32 %s106_s10, 4  ;;  %s129_s11 = int_to_ptr.vmem [resolvable:$true] %s2520_s11  ;;  %s1487_s12 = int_to_ptr.hbm [resolvable:$true] %s1486_s12 }
  0x3b   :  { %s1488_s7 = scalar_lea.hbm %s1487_s12, 1  ;;  %p1493_p5 = scmp.lt.s32.totalorder %s1487_s12, %s3138_s3 }
  0x3c   :  { %p1489_p10 = scmp.ne.s32.totalorder %s1487_s12, %s1488_s7  ;;  %p1494_p6 = scmp.lt.s32.totalorder %s2468_s21, %s1488_s7 }
  0x3e   :  { %p1490_p3 = pnand %p1489_p10, %p1295_p13  ;;  %p1495_p7 = por %p1494_p6, %p1493_p5 }
  0x40   :  { %p1491_p4 = pneg %p1490_p3 }
  0x42   :  { %p1496_p8 = pnand %p1495_p7, %p1491_p4 }
  0x44   :  { %1499 = shalt.err (!%p1496_p8)  }
  0x45   :  { %1233 = dma.hbm_to_vmem [thread:$0]  (%p1295_p13), %s106_s10, 16, %s108_s28, [#allocation3 + $0x3] }
  0x46   :  { %s116_s22 = scalar_lea.hbm %s3138_s3, %s1121_s26  ;;  %s1123_s23 = sld [smem:[#allocation6 + $0x5]] }
  0x47   :  { %s126_s6 = sshll.u32 %s116_s22, 4  ;;  %p1297_p2 = scmp.gt.s32.totalorder %s3136_s0, 5  ;;  %s127_s6 = int_to_ptr.hbm [resolvable:$true] %s126_s6 }
  0x48   :  { %s1514_s1 = sshra.s32 %s127_s6, 4  ;;  %s1515_s1 = int_to_ptr.hbm [resolvable:$true] %s1514_s1 }
  0x49   :  { %s1516_s2 = scalar_lea.hbm %s1515_s1, 1  ;;  %p1521_p13 = scmp.lt.s32.totalorder %s1515_s1, %s3138_s3 }
  0x4a   :  { %p1517_p9 = scmp.ne.s32.totalorder %s1515_s1, %s1516_s2  ;;  %p1522_p10 = scmp.lt.s32.totalorder %s2468_s21, %s1516_s2 }
  0x4c   :  { %p1518_p11 = pnand %p1517_p9, %p1296_p1  ;;  %p1523_p3 = por %p1522_p10, %p1521_p13 }
  0x4e   :  { %p1519_p12 = pneg %p1518_p11 }
  0x50   :  { %p1524_p4 = pnand %p1523_p3, %p1519_p12 }
  0x52   :  { %1527 = shalt.err (!%p1524_p4)  }
  0x53   :  { %1235 = dma.hbm_to_vmem [thread:$0]  (%p1296_p1), %s127_s6, 16, %s129_s11, [#allocation3 + $0x4] }
  0x54   :  { %s1125_s9 = sld [smem:[#allocation6 + $0x6]]  ;;  %s2379_s10 = smov [#allocation2 + $0x5]  }
  0x55   :  { %s149_s27 = sshll.u32 %s2379_s10, 4  ;;  %s137_s13 = scalar_lea.hbm %s3138_s3, %s1123_s23  ;;  %s150_s27 = int_to_ptr.vmem [resolvable:$true] %s149_s27 }
  0x56   :  { %s147_s14 = sshll.u32 %s137_s13, 4  ;;  %p1298_p5 = scmp.gt.s32.totalorder %s3136_s0, 6  ;;  %s148_s14 = int_to_ptr.hbm [resolvable:$true] %s147_s14 }
  0x57   :  { %s1542_s16 = sshra.s32 %s148_s14, 4  ;;  %s1543_s16 = int_to_ptr.hbm [resolvable:$true] %s1542_s16 }
  0x58   :  { %s1544_s18 = scalar_lea.hbm %s1543_s16, 1  ;;  %p1549_p8 = scmp.lt.s32.totalorder %s1543_s16, %s3138_s3 }
  0x59   :  { %p1545_p6 = scmp.ne.s32.totalorder %s1543_s16, %s1544_s18  ;;  %p1550_p9 = scmp.lt.s32.totalorder %s2468_s21, %s1544_s18 }
  0x5b   :  { %p1546_p1 = pnand %p1545_p6, %p1297_p2  ;;  %p1551_p11 = por %p1550_p9, %p1549_p8 }
  0x5d   :  { %p1547_p7 = pneg %p1546_p1 }
  0x5f   :  { %p1552_p12 = pnand %p1551_p11, %p1547_p7 }
  0x61   :  { %1555 = shalt.err (!%p1552_p12)  }
  0x62   :  { %1237 = dma.hbm_to_vmem [thread:$0]  (%p1297_p2), %s148_s14, 16, %s150_s27, [#allocation3 + $0x5] }
  0x63   :  { %s158_s1 = scalar_lea.hbm %s3138_s3, %s1125_s9  ;;  %s2380_s2 = smov [#allocation2 + $0x6]  }
  0x64   :  { %s170_s29 = sshll.u32 %s2380_s2, 4  ;;  %s168_s30 = sshll.u32 %s158_s1, 4  ;;  %s171_s29 = int_to_ptr.vmem [resolvable:$true] %s170_s29  ;;  %s169_s30 = int_to_ptr.hbm [resolvable:$true] %s168_s30 }
  0x65   :  { %s1127_s28 = sld [smem:[#allocation6 + $0x7]]  ;;  %s1570_s5 = sshra.s32 %s169_s30, 4  ;;  %s1571_s5 = int_to_ptr.hbm [resolvable:$true] %s1570_s5 }
  0x66   :  { %s1572_s26 = scalar_lea.hbm %s1571_s5, 1  ;;  %p1577_p3 = scmp.lt.s32.totalorder %s1571_s5, %s3138_s3 }
  0x67   :  { %p1573_p13 = scmp.ne.s32.totalorder %s1571_s5, %s1572_s26  ;;  %p1578_p4 = scmp.lt.s32.totalorder %s2468_s21, %s1572_s26 }
  0x69   :  { %p1574_p10 = pnand %p1573_p13, %p1298_p5  ;;  %p1579_p6 = por %p1578_p4, %p1577_p3 }
  0x6b   :  { %p1575_p2 = pneg %p1574_p10 }
  0x6d   :  { %p1580_p1 = pnand %p1579_p6, %p1575_p2 }
  0x6f   :  { %1583 = shalt.err (!%p1580_p1)  }
  0x70   :  { %1239 = dma.hbm_to_vmem [thread:$0]  (%p1298_p5), %s169_s30, 16, %s171_s29, [#allocation3 + $0x6] }
  0x71   :  { %p1299_p7 = scmp.gt.s32.totalorder %s3136_s0, 7  ;;  %s1129_s15 = sld [smem:[#allocation6 + $0x8]] }
  0x72   :  { %s2381_s17 = smov [#allocation2 + $0x7]   ;;  %p1300_p8 = scmp.gt.s32.totalorder %s3136_s0, 8 }
  0x73   :  { %s191_s16 = sshll.u32 %s2381_s17, 4  ;;  %s179_s22 = scalar_lea.hbm %s3138_s3, %s1127_s28  ;;  %s192_s16 = int_to_ptr.vmem [resolvable:$true] %s191_s16 }
  0x74   :  { %s189_s23 = sshll.u32 %s179_s22, 4  ;;  %s2382_s6 = smov [#allocation2 + $0x8]   ;;  %s190_s23 = int_to_ptr.hbm [resolvable:$true] %s189_s23 }
  0x75   :  { %s2597_s24 = sshll.u32 %s2382_s6, 4  ;;  %s1598_s25 = sshra.s32 %s190_s23, 4  ;;  %s213_s24 = int_to_ptr.vmem [resolvable:$true] %s2597_s24  ;;  %s1599_s25 = int_to_ptr.hbm [resolvable:$true] %s1598_s25 }
  0x76   :  { %s1600_s1 = scalar_lea.hbm %s1599_s25, 1  ;;  %p1605_p12 = scmp.lt.s32.totalorder %s1599_s25, %s3138_s3 }
  0x77   :  { %p1601_p5 = scmp.ne.s32.totalorder %s1599_s25, %s1600_s1  ;;  %p1606_p13 = scmp.lt.s32.totalorder %s2468_s21, %s1600_s1 }
  0x79   :  { %p1602_p9 = pnand %p1601_p5, %p1299_p7  ;;  %p1607_p10 = por %p1606_p13, %p1605_p12 }
  0x7b   :  { %p1603_p11 = pneg %p1602_p9 }
  0x7d   :  { %p1608_p2 = pnand %p1607_p10, %p1603_p11 }
  0x7f   :  { %1611 = shalt.err (!%p1608_p2)  }
  0x80   :  { %1241 = dma.hbm_to_vmem [thread:$0]  (%p1299_p7), %s190_s23, 16, %s192_s16, [#allocation3 + $0x7] }
  0x81   :  { %s200_s27 = scalar_lea.hbm %s3138_s3, %s1129_s15  ;;  %s1131_s12 = sld [smem:[#allocation6 + $0x9]] }
  0x82   :  { %s210_s9 = sshll.u32 %s200_s27, 4  ;;  %p1301_p3 = scmp.gt.s32.totalorder %s3136_s0, 9  ;;  %s211_s9 = int_to_ptr.hbm [resolvable:$true] %s210_s9 }
  0x83   :  { %s1626_s14 = sshra.s32 %s211_s9, 4  ;;  %s1627_s14 = int_to_ptr.hbm [resolvable:$true] %s1626_s14 }
  0x84   :  { %s1628_s17 = scalar_lea.hbm %s1627_s14, 1  ;;  %p1633_p7 = scmp.lt.s32.totalorder %s1627_s14, %s3138_s3 }
  0x85   :  { %p1629_p4 = scmp.ne.s32.totalorder %s1627_s14, %s1628_s17  ;;  %p1634_p5 = scmp.lt.s32.totalorder %s2468_s21, %s1628_s17 }
  0x87   :  { %p1630_p6 = pnand %p1629_p4, %p1300_p8  ;;  %p1635_p9 = por %p1634_p5, %p1633_p7 }
  0x89   :  { %p1631_p1 = pneg %p1630_p6 }
  0x8b   :  { %p1636_p11 = pnand %p1635_p9, %p1631_p1 }
  0x8d   :  { %1639 = shalt.err (!%p1636_p11)  }
  0x8e   :  { %1243 = dma.hbm_to_vmem [thread:$0]  (%p1300_p8), %s211_s9, 16, %s213_s24, [#allocation3 + $0x8] }
  0x8f   :  { %s1133_s22 = sld [smem:[#allocation6 + $0xa]]  ;;  %s2383_s23 = smov [#allocation2 + $0x9]  }
  0x90   :  { %s233_s6 = sshll.u32 %s2383_s23, 4  ;;  %s221_s2 = scalar_lea.hbm %s3138_s3, %s1131_s12  ;;  %s234_s6 = int_to_ptr.vmem [resolvable:$true] %s233_s6 }
  0x91   :  { %s231_s29 = sshll.u32 %s221_s2, 4  ;;  %p1302_p12 = scmp.gt.s32.totalorder %s3136_s0, 10  ;;  %s232_s29 = int_to_ptr.hbm [resolvable:$true] %s231_s29 }
  0x92   :  { %s1654_s28 = sshra.s32 %s232_s29, 4  ;;  %s1655_s28 = int_to_ptr.hbm [resolvable:$true] %s1654_s28 }
  0x93   :  { %s1656_s26 = scalar_lea.hbm %s1655_s28, 1  ;;  %p1661_p2 = scmp.lt.s32.totalorder %s1655_s28, %s3138_s3 }
  0x94   :  { %p1657_p13 = scmp.ne.s32.totalorder %s1655_s28, %s1656_s26  ;;  %p1662_p4 = scmp.lt.s32.totalorder %s2468_s21, %s1656_s26 }
  0x96   :  { %p1658_p8 = pnand %p1657_p13, %p1301_p3  ;;  %p1663_p6 = por %p1662_p4, %p1661_p2 }
  0x98   :  { %p1659_p10 = pneg %p1658_p8 }
  0x9a   :  { %p1664_p1 = pnand %p1663_p6, %p1659_p10 }
  0x9c   :  { %1667 = shalt.err (!%p1664_p1)  }
  0x9d   :  { %1245 = dma.hbm_to_vmem [thread:$0]  (%p1301_p3), %s232_s29, 16, %s234_s6, [#allocation3 + $0x9] }
  0x9e   :  { %s242_s14 = scalar_lea.hbm %s3138_s3, %s1133_s22  ;;  %s2384_s17 = smov [#allocation2 + $0xa]  }
  0x9f   :  { %s254_s18 = sshll.u32 %s2384_s17, 4  ;;  %s252_s11 = sshll.u32 %s242_s14, 4  ;;  %s255_s18 = int_to_ptr.vmem [resolvable:$true] %s254_s18  ;;  %s253_s11 = int_to_ptr.hbm [resolvable:$true] %s252_s11 }
  0xa0   :  { %s1135_s16 = sld [smem:[#allocation6 + $0xb]]  ;;  %s1682_s19 = sshra.s32 %s253_s11, 4  ;;  %s1683_s19 = int_to_ptr.hbm [resolvable:$true] %s1682_s19 }
  0xa1   :  { %s1684_s15 = scalar_lea.hbm %s1683_s19, 1  ;;  %p1689_p9 = scmp.lt.s32.totalorder %s1683_s19, %s3138_s3 }
  0xa2   :  { %p1685_p7 = scmp.ne.s32.totalorder %s1683_s19, %s1684_s15  ;;  %p1690_p11 = scmp.lt.s32.totalorder %s2468_s21, %s1684_s15 }
  0xa4   :  { %p1686_p5 = pnand %p1685_p7, %p1302_p12  ;;  %p1691_p13 = por %p1690_p11, %p1689_p9 }
  0xa6   :  { %p1687_p3 = pneg %p1686_p5 }
  0xa8   :  { %p1692_p8 = pnand %p1691_p13, %p1687_p3 }
  0xaa   :  { %1695 = shalt.err (!%p1692_p8)  }
  0xab   :  { %1247 = dma.hbm_to_vmem [thread:$0]  (%p1302_p12), %s253_s11, 16, %s255_s18, [#allocation3 + $0xa] }
  0xac   :  { %p1303_p10 = scmp.gt.s32.totalorder %s3136_s0, 11  ;;  %s1137_s30 = sld [smem:[#allocation6 + $0xc]] }
  0xad   :  { %s2385_s5 = smov [#allocation2 + $0xb]   ;;  %p1304_p2 = scmp.gt.s32.totalorder %s3136_s0, 12 }
  0xae   :  { %s275_s28 = sshll.u32 %s2385_s5, 4  ;;  %s263_s27 = scalar_lea.hbm %s3138_s3, %s1135_s16  ;;  %s276_s28 = int_to_ptr.vmem [resolvable:$true] %s275_s28 }
  0xaf   :  { %s273_s12 = sshll.u32 %s263_s27, 4  ;;  %s2386_s9 = smov [#allocation2 + $0xc]   ;;  %s274_s12 = int_to_ptr.hbm [resolvable:$true] %s273_s12 }
  0xb0   :  { %s2674_s7 = sshll.u32 %s2386_s9, 4  ;;  %s1710_s13 = sshra.s32 %s274_s12, 4  ;;  %s297_s7 = int_to_ptr.vmem [resolvable:$true] %s2674_s7  ;;  %s1711_s13 = int_to_ptr.hbm [resolvable:$true] %s1710_s13 }
  0xb1   :  { %s1712_s14 = scalar_lea.hbm %s1711_s13, 1  ;;  %p1717_p1 = scmp.lt.s32.totalorder %s1711_s13, %s3138_s3 }
  0xb2   :  { %p1713_p12 = scmp.ne.s32.totalorder %s1711_s13, %s1712_s14  ;;  %p1718_p7 = scmp.lt.s32.totalorder %s2468_s21, %s1712_s14 }
  0xb4   :  { %p1714_p4 = pnand %p1713_p12, %p1303_p10  ;;  %p1719_p5 = por %p1718_p7, %p1717_p1 }
  0xb6   :  { %p1715_p6 = pneg %p1714_p4 }
  0xb8   :  { %p1720_p3 = pnand %p1719_p5, %p1715_p6 }
  0xba   :  { %1723 = shalt.err (!%p1720_p3)  }
  0xbb   :  { %1249 = dma.hbm_to_vmem [thread:$0]  (%p1303_p10), %s274_s12, 16, %s276_s28, [#allocation3 + $0xb] }
  0xbc   :  { %s284_s6 = scalar_lea.hbm %s3138_s3, %s1137_s30  ;;  %s1139_s25 = sld [smem:[#allocation6 + $0xd]] }
  0xbd   :  { %s294_s22 = sshll.u32 %s284_s6, 4  ;;  %p1305_p9 = scmp.gt.s32.totalorder %s3136_s0, 13  ;;  %s295_s22 = int_to_ptr.hbm [resolvable:$true] %s294_s22 }
  0xbe   :  { %s1738_s29 = sshra.s32 %s295_s22, 4  ;;  %s1739_s29 = int_to_ptr.hbm [resolvable:$true] %s1738_s29 }
  0xbf   :  { %s1740_s5 = scalar_lea.hbm %s1739_s29, 1  ;;  %p1745_p10 = scmp.lt.s32.totalorder %s1739_s29, %s3138_s3 }
  0xc0   :  { %p1741_p11 = scmp.ne.s32.totalorder %s1739_s29, %s1740_s5  ;;  %p1746_p12 = scmp.lt.s32.totalorder %s2468_s21, %s1740_s5 }
  0xc2   :  { %p1742_p13 = pnand %p1741_p11, %p1304_p2  ;;  %p1747_p4 = por %p1746_p12, %p1745_p10 }
  0xc4   :  { %p1743_p8 = pneg %p1742_p13 }
  0xc6   :  { %p1748_p6 = pnand %p1747_p4, %p1743_p8 }
  0xc8   :  { %1751 = shalt.err (!%p1748_p6)  }
  0xc9   :  { %1251 = dma.hbm_to_vmem [thread:$0]  (%p1304_p2), %s295_s22, 16, %s297_s7, [#allocation3 + $0xc] }
  0xca   :  { %s1141_s27 = sld [smem:[#allocation6 + $0xe]]  ;;  %s2387_s12 = smov [#allocation2 + $0xd]  }
  0xcb   :  { %s317_s9 = sshll.u32 %s2387_s12, 4  ;;  %s305_s17 = scalar_lea.hbm %s3138_s3, %s1139_s25  ;;  %s318_s9 = int_to_ptr.vmem [resolvable:$true] %s317_s9 }
  0xcc   :  { %s315_s18 = sshll.u32 %s305_s17, 4  ;;  %p1306_p1 = scmp.gt.s32.totalorder %s3136_s0, 14  ;;  %s316_s18 = int_to_ptr.hbm [resolvable:$true] %s315_s18 }
  0xcd   :  { %s1766_s16 = sshra.s32 %s316_s18, 4  ;;  %s1767_s16 = int_to_ptr.hbm [resolvable:$true] %s1766_s16 }
  0xce   :  { %s1768_s15 = scalar_lea.hbm %s1767_s16, 1  ;;  %p1773_p3 = scmp.lt.s32.totalorder %s1767_s16, %s3138_s3 }
  0xcf   :  { %p1769_p7 = scmp.ne.s32.totalorder %s1767_s16, %s1768_s15  ;;  %p1774_p11 = scmp.lt.s32.totalorder %s2468_s21, %s1768_s15 }
  0xd1   :  { %p1770_p2 = pnand %p1769_p7, %p1305_p9  ;;  %p1775_p13 = por %p1774_p11, %p1773_p3 }
  0xd3   :  { %p1771_p5 = pneg %p1770_p2 }
  0xd5   :  { %p1776_p8 = pnand %p1775_p13, %p1771_p5 }
  0xd7   :  { %1779 = shalt.err (!%p1776_p8)  }
  0xd8   :  { %1253 = dma.hbm_to_vmem [thread:$0]  (%p1305_p9), %s316_s18, 16, %s318_s9, [#allocation3 + $0xd] }
  0xd9   :  { %s326_s29 = scalar_lea.hbm %s3138_s3, %s1141_s27  ;;  %s2388_s5 = smov [#allocation2 + $0xe]  }
  0xda   :  { %s338_s26 = sshll.u32 %s2388_s5, 4  ;;  %s336_s24 = sshll.u32 %s326_s29, 4  ;;  %s339_s26 = int_to_ptr.vmem [resolvable:$true] %s338_s26  ;;  %s337_s24 = int_to_ptr.hbm [resolvable:$true] %s336_s24 }
  0xdb   :  { %s1143_s28 = sld [smem:[#allocation6 + $0xf]]  ;;  %s1794_s8 = sshra.s32 %s337_s24, 4  ;;  %s1795_s8 = int_to_ptr.hbm [resolvable:$true] %s1794_s8 }
  0xdc   :  { %s1796_s30 = scalar_lea.hbm %s1795_s8, 1  ;;  %p1801_p4 = scmp.lt.s32.totalorder %s1795_s8, %s3138_s3 }
  0xdd   :  { %p1797_p10 = scmp.ne.s32.totalorder %s1795_s8, %s1796_s30  ;;  %p1802_p6 = scmp.lt.s32.totalorder %s2468_s21, %s1796_s30 }
  0xdf   :  { %p1798_p12 = pnand %p1797_p10, %p1306_p1  ;;  %p1803_p7 = por %p1802_p6, %p1801_p4 }
  0xe1   :  { %p1799_p9 = pneg %p1798_p12 }
  0xe3   :  { %p1804_p2 = pnand %p1803_p7, %p1799_p9 }
  0xe5   :  { %1807 = shalt.err (!%p1804_p2)  }
  0xe6   :  { %1255 = dma.hbm_to_vmem [thread:$0]  (%p1306_p1), %s337_s24, 16, %s339_s26, [#allocation3 + $0xe] }
  0xe7   :  { %p1307_p5 = scmp.gt.s32.totalorder %s3136_s0, 15  ;;  %s1145_s11 = sld [smem:[#allocation6 + $0x10]] }
  0xe8   :  { %s2389_s19 = smov [#allocation2 + $0xf]   ;;  %p1308_p3 = scmp.gt.s32.totalorder %s3136_s0, 16 }
  0xe9   :  { %s359_s16 = sshll.u32 %s2389_s19, 4  ;;  %s347_s6 = scalar_lea.hbm %s3138_s3, %s1143_s28  ;;  %s360_s16 = int_to_ptr.vmem [resolvable:$true] %s359_s16 }
  0xea   :  { %s357_s25 = sshll.u32 %s347_s6, 4  ;;  %s2390_s22 = smov [#allocation2 + $0x10]   ;;  %s358_s25 = int_to_ptr.hbm [resolvable:$true] %s357_s25 }
  0xeb   :  { %s2751_s1 = sshll.u32 %s2390_s22, 4  ;;  %s1822_s2 = sshra.s32 %s358_s25, 4  ;;  %s381_s1 = int_to_ptr.vmem [resolvable:$true] %s2751_s1  ;;  %s1823_s2 = int_to_ptr.hbm [resolvable:$true] %s1822_s2 }
  0xec   :  { %s1824_s29 = scalar_lea.hbm %s1823_s2, 1  ;;  %p1829_p8 = scmp.lt.s32.totalorder %s1823_s2, %s3138_s3 }
  0xed   :  { %p1825_p1 = scmp.ne.s32.totalorder %s1823_s2, %s1824_s29  ;;  %p1830_p10 = scmp.lt.s32.totalorder %s2468_s21, %s1824_s29 }
  0xef   :  { %p1826_p11 = pnand %p1825_p1, %p1307_p5  ;;  %p1831_p12 = por %p1830_p10, %p1829_p8 }
  0xf1   :  { %p1827_p13 = pneg %p1826_p11 }
  0xf3   :  { %p1832_p9 = pnand %p1831_p12, %p1827_p13 }
  0xf5   :  { %1835 = shalt.err (!%p1832_p9)  }
  0xf6   :  { %1257 = dma.hbm_to_vmem [thread:$0]  (%p1307_p5), %s358_s25, 16, %s360_s16, [#allocation3 + $0xf] }
  0xf7   :  { %s368_s9 = scalar_lea.hbm %s3138_s3, %s1145_s11  ;;  %s1147_s13 = sld [smem:[#allocation6 + $0x11]] }
  0xf8   :  { %s378_s27 = sshll.u32 %s368_s9, 4  ;;  %p1309_p4 = scmp.gt.s32.totalorder %s3136_s0, 17  ;;  %s379_s27 = int_to_ptr.hbm [resolvable:$true] %s378_s27 }
  0xf9   :  { %s1850_s18 = sshra.s32 %s379_s27, 4  ;;  %s1851_s18 = int_to_ptr.hbm [resolvable:$true] %s1850_s18 }
  0xfa   :  { %s1852_s19 = scalar_lea.hbm %s1851_s18, 1  ;;  %p1857_p5 = scmp.lt.s32.totalorder %s1851_s18, %s3138_s3 }
  0xfb   :  { %p1853_p6 = scmp.ne.s32.totalorder %s1851_s18, %s1852_s19  ;;  %p1858_p1 = scmp.lt.s32.totalorder %s2468_s21, %s1852_s19 }
  0xfd   :  { %p1854_p7 = pnand %p1853_p6, %p1308_p3  ;;  %p1859_p11 = por %p1858_p1, %p1857_p5 }
  0xff   :  { %p1855_p2 = pneg %p1854_p7 }
 0x101   :  { %p1860_p13 = pnand %p1859_p11, %p1855_p2 }
 0x103   :  { %1863 = shalt.err (!%p1860_p13)  }
 0x104   :  { %1259 = dma.hbm_to_vmem [thread:$0]  (%p1308_p3), %s379_s27, 16, %s381_s1, [#allocation3 + $0x10] }
 0x105   :  { %s1149_s6 = sld [smem:[#allocation6 + $0x12]]  ;;  %s2391_s25 = smov [#allocation2 + $0x11]  }
 0x106   :  { %s401_s22 = sshll.u32 %s2391_s25, 4  ;;  %s389_s5 = scalar_lea.hbm %s3138_s3, %s1147_s13  ;;  %s402_s22 = int_to_ptr.vmem [resolvable:$true] %s401_s22 }
 0x107   :  { %s399_s26 = sshll.u32 %s389_s5, 4  ;;  %p1310_p8 = scmp.gt.s32.totalorder %s3136_s0, 18  ;;  %s400_s26 = int_to_ptr.hbm [resolvable:$true] %s399_s26 }
 0x108   :  { %s1878_s28 = sshra.s32 %s400_s26, 4  ;;  %s1879_s28 = int_to_ptr.hbm [resolvable:$true] %s1878_s28 }
 0x109   :  { %s1880_s30 = scalar_lea.hbm %s1879_s28, 1  ;;  %p1885_p9 = scmp.lt.s32.totalorder %s1879_s28, %s3138_s3 }
 0x10a   :  { %p1881_p10 = scmp.ne.s32.totalorder %s1879_s28, %s1880_s30  ;;  %p1886_p6 = scmp.lt.s32.totalorder %s2468_s21, %s1880_s30 }
 0x10c   :  { %p1882_p3 = pnand %p1881_p10, %p1309_p4  ;;  %p1887_p7 = por %p1886_p6, %p1885_p9 }
 0x10e   :  { %p1883_p12 = pneg %p1882_p3 }
 0x110   :  { %p1888_p2 = pnand %p1887_p7, %p1883_p12 }
 0x112   :  { %1891 = shalt.err (!%p1888_p2)  }
 0x113   :  { %1261 = dma.hbm_to_vmem [thread:$0]  (%p1309_p4), %s400_s26, 16, %s402_s22, [#allocation3 + $0x11] }
 0x114   :  { %s410_s18 = scalar_lea.hbm %s3138_s3, %s1149_s6  ;;  %s2392_s19 = smov [#allocation2 + $0x12]  }
 0x115   :  { %s422_s15 = sshll.u32 %s2392_s19, 4  ;;  %s420_s7 = sshll.u32 %s410_s18, 4  ;;  %s423_s15 = int_to_ptr.vmem [resolvable:$true] %s422_s15  ;;  %s421_s7 = int_to_ptr.hbm [resolvable:$true] %s420_s7 }
 0x116   :  { %s1151_s16 = sld [smem:[#allocation6 + $0x13]]  ;;  %s1906_s20 = sshra.s32 %s421_s7, 4  ;;  %s1907_s20 = int_to_ptr.hbm [resolvable:$true] %s1906_s20 }
 0x117   :  { %s1908_s11 = scalar_lea.hbm %s1907_s20, 1  ;;  %p1913_p11 = scmp.lt.s32.totalorder %s1907_s20, %s3138_s3 }
 0x118   :  { %p1909_p5 = scmp.ne.s32.totalorder %s1907_s20, %s1908_s11  ;;  %p1914_p13 = scmp.lt.s32.totalorder %s2468_s21, %s1908_s11 }
 0x11a   :  { %p1910_p1 = pnand %p1909_p5, %p1310_p8  ;;  %p1915_p10 = por %p1914_p13, %p1913_p11 }
 0x11c   :  { %p1911_p4 = pneg %p1910_p1 }
 0x11e   :  { %p1916_p3 = pnand %p1915_p10, %p1911_p4 }
 0x120   :  { %1919 = shalt.err (!%p1916_p3)  }
 0x121   :  { %1263 = dma.hbm_to_vmem [thread:$0]  (%p1310_p8), %s421_s7, 16, %s423_s15, [#allocation3 + $0x12] }
 0x122   :  { %p1311_p12 = scmp.gt.s32.totalorder %s3136_s0, 19  ;;  %s1153_s24 = sld [smem:[#allocation6 + $0x14]] }
 0x123   :  { %s2393_s8 = smov [#allocation2 + $0x13]   ;;  %p1312_p9 = scmp.gt.s32.totalorder %s3136_s0, 20 }
 0x124   :  { %s443_s28 = sshll.u32 %s2393_s8, 4  ;;  %s431_s9 = scalar_lea.hbm %s3138_s3, %s1151_s16  ;;  %s444_s28 = int_to_ptr.vmem [resolvable:$true] %s443_s28 }
 0x125   :  { %s441_s13 = sshll.u32 %s431_s9, 4  ;;  %s2394_s27 = smov [#allocation2 + $0x14]   ;;  %s442_s13 = int_to_ptr.hbm [resolvable:$true] %s441_s13 }
 0x126   :  { %s2828_s14 = sshll.u32 %s2394_s27, 4  ;;  %s1934_s17 = sshra.s32 %s442_s13, 4  ;;  %s465_s14 = int_to_ptr.vmem [resolvable:$true] %s2828_s14  ;;  %s1935_s17 = int_to_ptr.hbm [resolvable:$true] %s1934_s17 }
 0x127   :  { %s1936_s18 = scalar_lea.hbm %s1935_s17, 1  ;;  %p1941_p2 = scmp.lt.s32.totalorder %s1935_s17, %s3138_s3 }
 0x128   :  { %p1937_p8 = scmp.ne.s32.totalorder %s1935_s17, %s1936_s18  ;;  %p1942_p5 = scmp.lt.s32.totalorder %s2468_s21, %s1936_s18 }
 0x12a   :  { %p1938_p6 = pnand %p1937_p8, %p1311_p12  ;;  %p1943_p1 = por %p1942_p5, %p1941_p2 }
 0x12c   :  { %p1939_p7 = pneg %p1938_p6 }
 0x12e   :  { %p1944_p4 = pnand %p1943_p1, %p1939_p7 }
 0x130   :  { %1947 = shalt.err (!%p1944_p4)  }
 0x131   :  { %1265 = dma.hbm_to_vmem [thread:$0]  (%p1311_p12), %s442_s13, 16, %s444_s28, [#allocation3 + $0x13] }
 0x132   :  { %s452_s22 = scalar_lea.hbm %s3138_s3, %s1153_s24  ;;  %s1155_s2 = sld [smem:[#allocation6 + $0x15]] }
 0x133   :  { %s462_s6 = sshll.u32 %s452_s22, 4  ;;  %p1313_p11 = scmp.gt.s32.totalorder %s3136_s0, 21  ;;  %s463_s6 = int_to_ptr.hbm [resolvable:$true] %s462_s6 }
 0x134   :  { %s1962_s26 = sshra.s32 %s463_s6, 4  ;;  %s1963_s26 = int_to_ptr.hbm [resolvable:$true] %s1962_s26 }
 0x135   :  { %s1964_s8 = scalar_lea.hbm %s1963_s26, 1  ;;  %p1969_p12 = scmp.lt.s32.totalorder %s1963_s26, %s3138_s3 }
 0x136   :  { %p1965_p13 = scmp.ne.s32.totalorder %s1963_s26, %s1964_s8  ;;  %p1970_p8 = scmp.lt.s32.totalorder %s2468_s21, %s1964_s8 }
 0x138   :  { %p1966_p10 = pnand %p1965_p13, %p1312_p9  ;;  %p1971_p6 = por %p1970_p8, %p1969_p12 }
 0x13a   :  { %p1967_p3 = pneg %p1966_p10 }
 0x13c   :  { %p1972_p7 = pnand %p1971_p6, %p1967_p3 }
 0x13e   :  { %1975 = shalt.err (!%p1972_p7)  }
 0x13f   :  { %1267 = dma.hbm_to_vmem [thread:$0]  (%p1312_p9), %s463_s6, 16, %s465_s14, [#allocation3 + $0x14] }
 0x140   :  { %s1157_s9 = sld [smem:[#allocation6 + $0x16]]  ;;  %s2395_s13 = smov [#allocation2 + $0x15]  }
 0x141   :  { %s485_s27 = sshll.u32 %s2395_s13, 4  ;;  %s473_s19 = scalar_lea.hbm %s3138_s3, %s1155_s2  ;;  %s486_s27 = int_to_ptr.vmem [resolvable:$true] %s485_s27 }
 0x142   :  { %s483_s15 = sshll.u32 %s473_s19, 4  ;;  %p1314_p2 = scmp.gt.s32.totalorder %s3136_s0, 22  ;;  %s484_s15 = int_to_ptr.hbm [resolvable:$true] %s483_s15 }
 0x143   :  { %s1990_s16 = sshra.s32 %s484_s15, 4  ;;  %s1991_s16 = int_to_ptr.hbm [resolvable:$true] %s1990_s16 }
 0x144   :  { %s1992_s11 = scalar_lea.hbm %s1991_s16, 1  ;;  %p1997_p4 = scmp.lt.s32.totalorder %s1991_s16, %s3138_s3 }
 0x145   :  { %p1993_p5 = scmp.ne.s32.totalorder %s1991_s16, %s1992_s11  ;;  %p1998_p13 = scmp.lt.s32.totalorder %s2468_s21, %s1992_s11 }
 0x147   :  { %p1994_p9 = pnand %p1993_p5, %p1313_p11  ;;  %p1999_p10 = por %p1998_p13, %p1997_p4 }
 0x149   :  { %p1995_p1 = pneg %p1994_p9 }
 0x14b   :  { %p2000_p3 = pnand %p1999_p10, %p1995_p1 }
 0x14d   :  { %2003 = shalt.err (!%p2000_p3)  }
 0x14e   :  { %1269 = dma.hbm_to_vmem [thread:$0]  (%p1313_p11), %s484_s15, 16, %s486_s27, [#allocation3 + $0x15] }
 0x14f   :  { %s494_s26 = scalar_lea.hbm %s3138_s3, %s1157_s9  ;;  %s2396_s8 = smov [#allocation2 + $0x16]  }
 0x150   :  { %s506_s30 = sshll.u32 %s2396_s8, 4  ;;  %s504_s1 = sshll.u32 %s494_s26, 4  ;;  %s507_s30 = int_to_ptr.vmem [resolvable:$true] %s506_s30  ;;  %s505_s1 = int_to_ptr.hbm [resolvable:$true] %s504_s1 }
 0x151   :  { %s1159_s28 = sld [smem:[#allocation6 + $0x17]]  ;;  %s2018_s10 = sshra.s32 %s505_s1, 4  ;;  %s2019_s10 = int_to_ptr.hbm [resolvable:$true] %s2018_s10 }
 0x152   :  { %s2020_s24 = scalar_lea.hbm %s2019_s10, 1  ;;  %p2025_p6 = scmp.lt.s32.totalorder %s2019_s10, %s3138_s3 }
 0x153   :  { %p2021_p12 = scmp.ne.s32.totalorder %s2019_s10, %s2020_s24  ;;  %p2026_p7 = scmp.lt.s32.totalorder %s2468_s21, %s2020_s24 }
 0x155   :  { %p2022_p8 = pnand %p2021_p12, %p1314_p2  ;;  %p2027_p5 = por %p2026_p7, %p2025_p6 }
 0x157   :  { %p2023_p11 = pneg %p2022_p8 }
 0x159   :  { %p2028_p9 = pnand %p2027_p5, %p2023_p11 }
 0x15b   :  { %2031 = shalt.err (!%p2028_p9)  }
 0x15c   :  { %1271 = dma.hbm_to_vmem [thread:$0]  (%p1314_p2), %s505_s1, 16, %s507_s30, [#allocation3 + $0x16] }
 0x15d   :  { %p1315_p1 = scmp.gt.s32.totalorder %s3136_s0, 23  ;;  %s1161_s7 = sld [smem:[#allocation6 + $0x18]] }
 0x15e   :  { %s2397_s20 = smov [#allocation2 + $0x17]   ;;  %p1316_p4 = scmp.gt.s32.totalorder %s3136_s0, 24 }
 0x15f   :  { %s527_s16 = sshll.u32 %s2397_s20, 4  ;;  %s515_s22 = scalar_lea.hbm %s3138_s3, %s1159_s28  ;;  %s528_s16 = int_to_ptr.vmem [resolvable:$true] %s527_s16 }
 0x160   :  { %s525_s2 = sshll.u32 %s515_s22, 4  ;;  %s2398_s6 = smov [#allocation2 + $0x18]   ;;  %s526_s2 = int_to_ptr.hbm [resolvable:$true] %s525_s2 }
 0x161   :  { %s2905_s29 = sshll.u32 %s2398_s6, 4  ;;  %s2046_s5 = sshra.s32 %s526_s2, 4  ;;  %s549_s29 = int_to_ptr.vmem [resolvable:$true] %s2905_s29  ;;  %s2047_s5 = int_to_ptr.hbm [resolvable:$true] %s2046_s5 }
 0x162   :  { %s2048_s26 = scalar_lea.hbm %s2047_s5, 1  ;;  %p2053_p3 = scmp.lt.s32.totalorder %s2047_s5, %s3138_s3 }
 0x163   :  { %p2049_p2 = scmp.ne.s32.totalorder %s2047_s5, %s2048_s26  ;;  %p2054_p12 = scmp.lt.s32.totalorder %s2468_s21, %s2048_s26 }
 0x165   :  { %p2050_p13 = pnand %p2049_p2, %p1315_p1  ;;  %p2055_p8 = por %p2054_p12, %p2053_p3 }
 0x167   :  { %p2051_p10 = pneg %p2050_p13 }
 0x169   :  { %p2056_p11 = pnand %p2055_p8, %p2051_p10 }
 0x16b   :  { %2059 = shalt.err (!%p2056_p11)  }
 0x16c   :  { %1273 = dma.hbm_to_vmem [thread:$0]  (%p1315_p1), %s526_s2, 16, %s528_s16, [#allocation3 + $0x17] }
 0x16d   :  { %s536_s27 = scalar_lea.hbm %s3138_s3, %s1161_s7  ;;  %s1163_s17 = sld [smem:[#allocation6 + $0x19]] }
 0x16e   :  { %s546_s9 = sshll.u32 %s536_s27, 4  ;;  %p1317_p6 = scmp.gt.s32.totalorder %s3136_s0, 25  ;;  %s547_s9 = int_to_ptr.hbm [resolvable:$true] %s546_s9 }
 0x16f   :  { %s2074_s15 = sshra.s32 %s547_s9, 4  ;;  %s2075_s15 = int_to_ptr.hbm [resolvable:$true] %s2074_s15 }
 0x170   :  { %s2076_s20 = scalar_lea.hbm %s2075_s15, 1  ;;  %p2081_p1 = scmp.lt.s32.totalorder %s2075_s15, %s3138_s3 }
 0x171   :  { %p2077_p7 = scmp.ne.s32.totalorder %s2075_s15, %s2076_s20  ;;  %p2082_p2 = scmp.lt.s32.totalorder %s2468_s21, %s2076_s20 }
 0x173   :  { %p2078_p5 = pnand %p2077_p7, %p1316_p4  ;;  %p2083_p13 = por %p2082_p2, %p2081_p1 }
 0x175   :  { %p2079_p9 = pneg %p2078_p5 }
 0x177   :  { %p2084_p10 = pnand %p2083_p13, %p2079_p9 }
 0x179   :  { %2087 = shalt.err (!%p2084_p10)  }
 0x17a   :  { %1275 = dma.hbm_to_vmem [thread:$0]  (%p1316_p4), %s547_s9, 16, %s549_s29, [#allocation3 + $0x18] }
 0x17b   :  { %s1165_s22 = sld [smem:[#allocation6 + $0x1a]]  ;;  %s2399_s2 = smov [#allocation2 + $0x19]  }
 0x17c   :  { %s569_s6 = sshll.u32 %s2399_s2, 4  ;;  %s557_s8 = scalar_lea.hbm %s3138_s3, %s1163_s17  ;;  %s570_s6 = int_to_ptr.vmem [resolvable:$true] %s569_s6 }
 0x17d   :  { %s567_s30 = sshll.u32 %s557_s8, 4  ;;  %p1318_p3 = scmp.gt.s32.totalorder %s3136_s0, 26  ;;  %s568_s30 = int_to_ptr.hbm [resolvable:$true] %s567_s30 }
 0x17e   :  { %s2102_s28 = sshra.s32 %s568_s30, 4  ;;  %s2103_s28 = int_to_ptr.hbm [resolvable:$true] %s2102_s28 }
 0x17f   :  { %s2104_s24 = scalar_lea.hbm %s2103_s28, 1  ;;  %p2109_p11 = scmp.lt.s32.totalorder %s2103_s28, %s3138_s3 }
 0x180   :  { %p2105_p12 = scmp.ne.s32.totalorder %s2103_s28, %s2104_s24  ;;  %p2110_p7 = scmp.lt.s32.totalorder %s2468_s21, %s2104_s24 }
 0x182   :  { %p2106_p4 = pnand %p2105_p12, %p1317_p6  ;;  %p2111_p5 = por %p2110_p7, %p2109_p11 }
 0x184   :  { %p2107_p8 = pneg %p2106_p4 }
 0x186   :  { %p2112_p9 = pnand %p2111_p5, %p2107_p8 }
 0x188   :  { %2115 = shalt.err (!%p2112_p9)  }
 0x189   :  { %1277 = dma.hbm_to_vmem [thread:$0]  (%p1317_p6), %s568_s30, 16, %s570_s6, [#allocation3 + $0x19] }
 0x18a   :  { %s578_s15 = scalar_lea.hbm %s3138_s3, %s1165_s22  ;;  %s2400_s20 = smov [#allocation2 + $0x1a]  }
 0x18b   :  { %s590_s11 = sshll.u32 %s2400_s20, 4  ;;  %s588_s14 = sshll.u32 %s578_s15, 4  ;;  %s591_s11 = int_to_ptr.vmem [resolvable:$true] %s590_s11  ;;  %s589_s14 = int_to_ptr.hbm [resolvable:$true] %s588_s14 }
 0x18c   :  { %s1167_s16 = sld [smem:[#allocation6 + $0x1b]]  ;;  %s2130_s23 = sshra.s32 %s589_s14, 4  ;;  %s2131_s23 = int_to_ptr.hbm [resolvable:$true] %s2130_s23 }
 0x18d   :  { %s2132_s7 = scalar_lea.hbm %s2131_s23, 1  ;;  %p2137_p13 = scmp.lt.s32.totalorder %s2131_s23, %s3138_s3 }
 0x18e   :  { %p2133_p1 = scmp.ne.s32.totalorder %s2131_s23, %s2132_s7  ;;  %p2138_p10 = scmp.lt.s32.totalorder %s2468_s21, %s2132_s7 }
 0x190   :  { %p2134_p2 = pnand %p2133_p1, %p1318_p3  ;;  %p2139_p12 = por %p2138_p10, %p2137_p13 }
 0x192   :  { %p2135_p6 = pneg %p2134_p2 }
 0x194   :  { %p2140_p4 = pnand %p2139_p12, %p2135_p6 }
 0x196   :  { %2143 = shalt.err (!%p2140_p4)  }
 0x197   :  { %1279 = dma.hbm_to_vmem [thread:$0]  (%p1318_p3), %s589_s14, 16, %s591_s11, [#allocation3 + $0x1a] }
 0x198   :  { %p1319_p8 = scmp.gt.s32.totalorder %s3136_s0, 27  ;;  %s1169_s1 = sld [smem:[#allocation6 + $0x1c]] }
 0x199   :  { %s2401_s10 = smov [#allocation2 + $0x1b]   ;;  %p1320_p11 = scmp.gt.s32.totalorder %s3136_s0, 28 }
 0x19a   :  { %s611_s28 = sshll.u32 %s2401_s10, 4  ;;  %s599_s27 = scalar_lea.hbm %s3138_s3, %s1167_s16  ;;  %s612_s28 = int_to_ptr.vmem [resolvable:$true] %s611_s28 }
 0x19b   :  { %s609_s17 = sshll.u32 %s599_s27, 4  ;;  %s2402_s9 = smov [#allocation2 + $0x1c]   ;;  %s610_s17 = int_to_ptr.hbm [resolvable:$true] %s609_s17 }
 0x19c   :  { %s2982_s18 = sshll.u32 %s2402_s9, 4  ;;  %s2158_s19 = sshra.s32 %s610_s17, 4  ;;  %s633_s18 = int_to_ptr.vmem [resolvable:$true] %s2982_s18  ;;  %s2159_s19 = int_to_ptr.hbm [resolvable:$true] %s2158_s19 }
 0x19d   :  { %s2160_s15 = scalar_lea.hbm %s2159_s19, 1  ;;  %p2165_p9 = scmp.lt.s32.totalorder %s2159_s19, %s3138_s3 }
 0x19e   :  { %p2161_p3 = scmp.ne.s32.totalorder %s2159_s19, %s2160_s15  ;;  %p2166_p1 = scmp.lt.s32.totalorder %s2468_s21, %s2160_s15 }
 0x1a0   :  { %p2162_p7 = pnand %p2161_p3, %p1319_p8  ;;  %p2167_p2 = por %p2166_p1, %p2165_p9 }
 0x1a2   :  { %p2163_p5 = pneg %p2162_p7 }
 0x1a4   :  { %p2168_p6 = pnand %p2167_p2, %p2163_p5 }
 0x1a6   :  { %2171 = shalt.err (!%p2168_p6)  }
 0x1a7   :  { %1281 = dma.hbm_to_vmem [thread:$0]  (%p1319_p8), %s610_s17, 16, %s612_s28, [#allocation3 + $0x1b] }
 0x1a8   :  { %s620_s6 = scalar_lea.hbm %s3138_s3, %s1169_s1  ;;  %s1171_s5 = sld [smem:[#allocation6 + $0x1d]] }
 0x1a9   :  { %s630_s22 = sshll.u32 %s620_s6, 4  ;;  %p1321_p13 = scmp.gt.s32.totalorder %s3136_s0, 29  ;;  %s631_s22 = int_to_ptr.hbm [resolvable:$true] %s630_s22 }
 0x1aa   :  { %s2186_s30 = sshra.s32 %s631_s22, 4  ;;  %s2187_s30 = int_to_ptr.hbm [resolvable:$true] %s2186_s30 }
 0x1ab   :  { %s2188_s10 = scalar_lea.hbm %s2187_s30, 1  ;;  %p2193_p8 = scmp.lt.s32.totalorder %s2187_s30, %s3138_s3 }
 0x1ac   :  { %p2189_p10 = scmp.ne.s32.totalorder %s2187_s30, %s2188_s10  ;;  %p2194_p3 = scmp.lt.s32.totalorder %s2468_s21, %s2188_s10 }
 0x1ae   :  { %p2190_p12 = pnand %p2189_p10, %p1320_p11  ;;  %p2195_p7 = por %p2194_p3, %p2193_p8 }
 0x1b0   :  { %p2191_p4 = pneg %p2190_p12 }
 0x1b2   :  { %p2196_p5 = pnand %p2195_p7, %p2191_p4 }
 0x1b4   :  { %2199 = shalt.err (!%p2196_p5)  }
 0x1b5   :  { %1283 = dma.hbm_to_vmem [thread:$0]  (%p1320_p11), %s631_s22, 16, %s633_s18, [#allocation3 + $0x1c] }
 0x1b6   :  { %s1173_s27 = sld [smem:[#allocation6 + $0x1e]]  ;;  %s2403_s17 = smov [#allocation2 + $0x1d]  }
 0x1b7   :  { %s653_s9 = sshll.u32 %s2403_s17, 4  ;;  %s641_s20 = scalar_lea.hbm %s3138_s3, %s1171_s5  ;;  %s654_s9 = int_to_ptr.vmem [resolvable:$true] %s653_s9 }
 0x1b8   :  { %s651_s11 = sshll.u32 %s641_s20, 4  ;;  %p1322_p9 = scmp.gt.s32.totalorder %s3136_s0, 30  ;;  %s652_s11 = int_to_ptr.hbm [resolvable:$true] %s651_s11 }
 0x1b9   :  { %s2214_s16 = sshra.s32 %s652_s11, 4  ;;  %s2215_s16 = int_to_ptr.hbm [resolvable:$true] %s2214_s16 }
 0x1ba   :  { %s2216_s7 = scalar_lea.hbm %s2215_s16, 1  ;;  %p2221_p6 = scmp.lt.s32.totalorder %s2215_s16, %s3138_s3 }
 0x1bb   :  { %p2217_p1 = scmp.ne.s32.totalorder %s2215_s16, %s2216_s7  ;;  %p2222_p10 = scmp.lt.s32.totalorder %s2468_s21, %s2216_s7 }
 0x1bd   :  { %p2218_p11 = pnand %p2217_p1, %p1321_p13  ;;  %p2223_p12 = por %p2222_p10, %p2221_p6 }
 0x1bf   :  { %p2219_p2 = pneg %p2218_p11 }
 0x1c1   :  { %p2224_p4 = pnand %p2223_p12, %p2219_p2 }
 0x1c3   :  { %2227 = shalt.err (!%p2224_p4)  }
 0x1c4   :  { %1285 = dma.hbm_to_vmem [thread:$0]  (%p1321_p13), %s652_s11, 16, %s654_s9, [#allocation3 + $0x1d] }
 0x1c5   :  { %s662_s30 = scalar_lea.hbm %s3138_s3, %s1173_s27  ;;  %s2404_s10 = smov [#allocation2 + $0x1e]  }
 0x1c6   :  { %s674_s24 = sshll.u32 %s2404_s10, 4  ;;  %s672_s29 = sshll.u32 %s662_s30, 4  ;;  %s675_s24 = int_to_ptr.vmem [resolvable:$true] %s674_s24  ;;  %s673_s29 = int_to_ptr.hbm [resolvable:$true] %s672_s29 }
 0x1c7   :  { %s1175_s28 = sld [smem:[#allocation6 + $0x1f]]  ;;  %s2242_s12 = sshra.s32 %s673_s29, 4  ;;  %s2243_s12 = int_to_ptr.hbm [resolvable:$true] %s2242_s12 }
 0x1c8   :  { %s2244_s1 = scalar_lea.hbm %s2243_s12, 1  ;;  %p2249_p7 = scmp.lt.s32.totalorder %s2243_s12, %s3138_s3 }
 0x1c9   :  { %p2245_p8 = scmp.ne.s32.totalorder %s2243_s12, %s2244_s1  ;;  %p2250_p5 = scmp.lt.s32.totalorder %s2468_s21, %s2244_s1 }
 0x1cb   :  { %p2246_p3 = pnand %p2245_p8, %p1322_p9  ;;  %p2251_p1 = por %p2250_p5, %p2249_p7 }
 0x1cd   :  { %p2247_p13 = pneg %p2246_p3 }
 0x1cf   :  { %p2252_p11 = pnand %p2251_p1, %p2247_p13 }
 0x1d1   :  { %2255 = shalt.err (!%p2252_p11)  }
 0x1d2   :  { %1287 = dma.hbm_to_vmem [thread:$0]  (%p1322_p9), %s673_s29, 16, %s675_s24, [#allocation3 + $0x1e] }
 0x1d3   :  { %s2405_s20 = smov [#allocation2 + $0x1f]   ;;  %p1323_p2 = scmp.gt.s32.totalorder %s3136_s0, 31 }
 0x1d4   :  { %s695_s11 = sshll.u32 %s2405_s20, 4  ;;  %s683_s18 = scalar_lea.hbm %s3138_s3, %s1175_s28  ;;  %s696_s11 = int_to_ptr.vmem [resolvable:$true] %s695_s11 }
 0x1d5   :  { %s693_s25 = sshll.u32 %s683_s18, 4  ;;  %s694_s25 = int_to_ptr.hbm [resolvable:$true] %s693_s25 }
 0x1d6   :  { %s2270_s2 = sshra.s32 %s694_s25, 4  ;;  %s2271_s2 = int_to_ptr.hbm [resolvable:$true] %s2270_s2 }
 0x1d7   :  { %s2272_s6 = scalar_lea.hbm %s2271_s2, 1  ;;  %p2277_p12 = scmp.lt.s32.totalorder %s2271_s2, %s3138_s3 }
 0x1d8   :  { %p2273_p6 = scmp.ne.s32.totalorder %s2271_s2, %s2272_s6  ;;  %p2278_p4 = scmp.lt.s32.totalorder %s2468_s21, %s2272_s6 }
 0x1da   :  { %p2274_p9 = pnand %p2273_p6, %p1323_p2  ;;  %p2279_p8 = por %p2278_p4, %p2277_p12 }
 0x1dc   :  { %p2275_p10 = pneg %p2274_p9 }
 0x1de   :  { %p2280_p3 = pnand %p2279_p8, %p2275_p10 }
 0x1e0   :  { %2283 = shalt.err (!%p2280_p3)  }
 0x1e1   :  { %1289 = dma.hbm_to_vmem [thread:$0]  (%p1323_p2), %s694_s25, 16, %s696_s11, [#allocation3 + $0x1f] }
 0x1e2   :  { %1106 = sbr.rel (%p1114_p0) target bundleno = 531 (0x213), region = 440  ;;  %s3072_s28 = smov (!%p1114_p0), 0  }
 0x1e7 LB: > { %s705_s12 = sand.u32 31, %s2366_s28  ;;  %s3079_s1 = sadd.s32 32, %s2366_s28  ;;  %s2366_s28 = sphi %s3072_s28, %s702_s28  }
 0x1e8   : > { %p707_p13 = scmp.lt.s32.totalorder %s3079_s1, 255  ;;  %s3083_s9 = scalar_lea.sflag [#allocation3], %s705_s12 }
 0x1ea   : > { %s708_s13 = scalar_select %p707_p13, %s3079_s1, 255 }
 0x1ec   : > { %s709_s17 = sld [smem:[#allocation6 + %s708_s13]] }
 0x1ed   : > { %2360 = dma.done.wait %s3083_s9, 16 }
 0x1ee   : > { %2361 = vsyncadd %s3083_s9, 4294967280  ;;  %p1324_p0 = scmp.lt.s32.totalorder %s3079_s1, %s3136_s0  ;;  %s1071_s14 = scalar_lea.vmem [#allocation2], %s2366_s28 }
 0x1ef   : > { %s1072_s23 = scalar_lea.vmem %s1071_s14, 32 [#allocation2] }
 0x1f0   : > { %s729_s7 = sshll.u32 %s1072_s23, 4  ;;  %s730_s7 = int_to_ptr.vmem [resolvable:$true] %s729_s7 }
 0x1f2   : > { %s718_s11 = scalar_lea.hbm %s3138_s3, %s709_s17 }
 0x1f3   : > { %s3095_s16 = sshll.u32 %s718_s11, 4  ;;  %s728_s16 = int_to_ptr.hbm [resolvable:$true] %s3095_s16 }
 0x1f4   : > { %s2298_s18 = sshra.s32 %s728_s16, 4  ;;  %s2299_s18 = int_to_ptr.hbm [resolvable:$true] %s2298_s18 }
 0x1f5   : > { %s2300_s25 = scalar_lea.hbm %s2299_s18, 1  ;;  %p2305_p11 = scmp.lt.s32.totalorder %s2299_s18, %s3138_s3 }
 0x1f6   : > { %p2301_p7 = scmp.ne.s32.totalorder %s2299_s18, %s2300_s25  ;;  %p2306_p2 = scmp.lt.s32.totalorder %s2468_s21, %s2300_s25 }
 0x1f8   : > { %p2302_p5 = pnand %p2301_p7, %p1324_p0  ;;  %p2307_p6 = por %p2306_p2, %p2305_p11 }
 0x1fa   : > { %p2303_p1 = pneg %p2302_p5 }
 0x1fc   : > { %p2308_p9 = pnand %p2307_p6, %p2303_p1 }
 0x1fe   : > { %2311 = shalt.err (!%p2308_p9)  }
 0x1ff   : > { %s2312_s26 = sshra.s32 %s730_s7, 4  ;;  %s2406_s24 = smov [#allocation2]   ;;  %s2313_s26 = int_to_ptr.vmem [resolvable:$true] %s2312_s26 }
 0x200   : > { %s2314_s8 = scalar_lea.vmem %s2313_s26, 1  ;;  %s2318_s29 = scalar_lea.vmem %s2406_s24, 256 }
 0x201   : > { %p2315_p10 = scmp.ne.s32.totalorder %s2313_s26, %s2314_s8  ;;  %p2319_p8 = scmp.lt.s32.totalorder %s2313_s26, [#allocation2] }
 0x202   : > { %p2320_p3 = scmp.lt.s32.totalorder %s2318_s29, %s2314_s8 }
 0x203   : > { %p2316_p12 = pnand %p2315_p10, %p1324_p0 }
 0x204   : > { %p2321_p13 = por %p2320_p3, %p2319_p8 }
 0x205   : > { %p2317_p4 = pneg %p2316_p12 }
 0x207   : > { %p2322_p7 = pnand %p2321_p13, %p2317_p4 }
 0x209   : > { %2325 = shalt.err (!%p2322_p7)  }
 0x20a   : > { %1291 = dma.hbm_to_vmem [thread:$0]  (%p1324_p0), %s728_s16, 16, %s730_s7, %s3083_s9 }
 0x20b   : > { %s702_s28 = sadd.s32 1, %s2366_s28  }
 0x20c   : > { %p701_p5 = scmp.ge.s32.totalorder %s702_s28, %s3136_s0 }
 0x20e   :  { %704 = sbr.rel (!%p701_p5) target bundleno = 487 (0x1e7), region = 446 }
 0x213 PF:  { %s3124_s27 = smov 0  }
 0x214 LB: > { %s1179_s1 = sshll.u32 %s2370_s27, 3  ;;  %s739_s27 = sadd.s32 1, %s2370_s27   ;;  %s2370_s27 = sphi %s3124_s27, %s739_s27  }
 0x215   : > { %s742_s9 = sld [smem:[#allocation7 + %s1179_s1]]  ;;  %s747_s15 = sadd.s32 1, %s1179_s1 }
 0x216   : > { %s754_s20 = sadd.s32 2, %s1179_s1  ;;  %s748_s11 = sld [smem:[#allocation7 + %s747_s15]] }
 0x217   : > { %s761_s14 = sadd.s32 3, %s1179_s1  ;;  %s755_s23 = sld [smem:[#allocation7 + %s754_s20]] }
 0x218   : > { %s768_s16 = sadd.s32 4, %s1179_s1  ;;  %s762_s7 = sld [smem:[#allocation7 + %s761_s14]] }
 0x219   : > { %s775_s28 = sadd.s32 5, %s1179_s1  ;;  %s769_s18 = sld [smem:[#allocation7 + %s768_s16]] }
 0x21a   : > { %s782_s0 = sadd.s32 6, %s1179_s1  ;;  %s776_s3 = sld [smem:[#allocation7 + %s775_s28]] }
 0x21b   : > { %s743_s21 = scalar_lea.vmem [#allocation2], %s742_s9  ;;  %s783_s25 = sld [smem:[#allocation7 + %s782_s0]] }
 0x21c   : > { %v744_v0 = vld [vmem:[%s743_s21] sm:$0x1]  ;;  %s789_s2 = sadd.s32 7, %s1179_s1  ;;  %s745_s6 = scalar_lea.vmem [#allocation8], %s1179_s1 }
 0x21d   : > { %746 = vst [vmem:[%s745_s6] sm:$0x1] %v744_v0  ;;  %s790_s5 = sld [smem:[#allocation7 + %s789_s2]]  ;;  %s749_s22 = scalar_lea.vmem [#allocation2], %s748_s11 }
 0x21e   : > { %v750_v1 = vld [vmem:[%s749_s22] sm:$0x1]  ;;  %s756_s26 = scalar_lea.vmem [#allocation2], %s755_s23  ;;  %s763_s8 = scalar_lea.vmem [#allocation2], %s762_s7 }
 0x21f   : > { %1181 = vst [vmem:[%s745_s6 + $0x1] sm:$0x1] %v750_v1  ;;  %v757_v2 = vld [vmem:[%s756_s26] sm:$0x1]  ;;  %s770_s30 = scalar_lea.vmem [#allocation2], %s769_s18  ;;  %p736_p0 = scmp.ge.s32.totalorder %s739_s27, 32  }
 0x220   : > { %1183 = vst [vmem:[%s745_s6 + $0x2] sm:$0x1] %v757_v2  ;;  %v764_v3 = vld [vmem:[%s763_s8] sm:$0x1]  ;;  %s777_s10 = scalar_lea.vmem [#allocation2], %s776_s3  ;;  %s802_s17 = sshll.u32 (%p736_p0), %s3139_s4, 4  ;;  %s803_s17 = int_to_ptr.hbm [resolvable:$true] %s802_s17 }
 0x221   : > { %1185 = vst [vmem:[%s745_s6 + $0x3] sm:$0x1] %v764_v3  ;;  %v771_v4 = vld [vmem:[%s770_s30] sm:$0x1]  ;;  %s784_s24 = scalar_lea.vmem [#allocation2], %s783_s25  ;;  %738 = sbr.rel (!%p736_p0) target bundleno = 532 (0x214), region = 457 }
 0x222   : > { %1187 = vst [vmem:[%s745_s6 + $0x4] sm:$0x1] %v771_v4  ;;  %v778_v5 = vld [vmem:[%s777_s10] sm:$0x1]  ;;  %s2407_s19 = smov (%p736_p0), [#allocation8]   ;;  %s2408_s9 = smov (%p736_p0), 128  }
 0x223   : > { %1189 = vst [vmem:[%s745_s6 + $0x5] sm:$0x1] %v778_v5  ;;  %v785_v6 = vld [vmem:[%s784_s24] sm:$0x1]  ;;  %s791_s29 = scalar_lea.vmem [#allocation2], %s790_s5  ;;  %s800_s1 = sshll.u32 (%p736_p0), %s2407_s19, 4  ;;  %s801_s1 = int_to_ptr.vmem [resolvable:$true] %s800_s1 }
 0x224   : > { %1191 = vst [vmem:[%s745_s6 + $0x6] sm:$0x1] %v785_v6  ;;  %v792_v7 = vld [vmem:[%s791_s29] sm:$0x1]  ;;  %s2409_s15 = smov (%p736_p0), 8  }
 0x225   : > { %1193 = vst [vmem:[%s745_s6 + $0x7] sm:$0x1] %v792_v7 }
 0x226   :  { %808 = dma.vmem_to_hbm [thread:$0]  %s801_s1, 4096, %s803_s17, [#allocation9], %s2408_s9, %s2408_s9, %s2409_s15  }
 0x227   :  { %2362 = dma.done.wait [#allocation9], 4096  }
 0x228   :  { %2363 = vsyncadd [#allocation9], 4294963200 }
 0x229   :  { %813 = vsyncpa [#allocation9], 1 }
 0x22a   :  { %814 = vsyncmov [#allocation3] }
 0x22d   :  { %s815_s20 = vpop.sfrf %814 }
 0x22e   :  { %p1194_p1 = scmp.ne.s32.totalorder %s815_s20, 0 }
 0x230   :  { %819 = shalt.err (%p1194_p1)  }
 0x231   :  { %821 = vsyncmov [#allocation3 + $0x1] }
 0x234   :  { %s822_s27 = vpop.sfrf %821 }
 0x235   :  { %p1195_p11 = scmp.ne.s32.totalorder %s822_s27, 0 }
 0x237   :  { %826 = shalt.err (%p1195_p11)  }
 0x238   :  { %828 = vsyncmov [#allocation3 + $0x2] }
 0x23b   :  { %s829_s4 = vpop.sfrf %828 }
 0x23c   :  { %p1196_p2 = scmp.ne.s32.totalorder %s829_s4, 0 }
 0x23e   :  { %833 = shalt.err (%p1196_p2)  }
 0x23f   :  { %835 = vsyncmov [#allocation3 + $0x3] }
 0x242   :  { %s836_s11 = vpop.sfrf %835 }
 0x243   :  { %p1197_p6 = scmp.ne.s32.totalorder %s836_s11, 0 }
 0x245   :  { %840 = shalt.err (%p1197_p6)  }
 0x246   :  { %842 = vsyncmov [#allocation3 + $0x4] }
 0x249   :  { %s843_s14 = vpop.sfrf %842 }
 0x24a   :  { %p1198_p9 = scmp.ne.s32.totalorder %s843_s14, 0 }
 0x24c   :  { %847 = shalt.err (%p1198_p9)  }
 0x24d   :  { %849 = vsyncmov [#allocation3 + $0x5] }
 0x250   :  { %s850_s23 = vpop.sfrf %849 }
 0x251   :  { %p1199_p10 = scmp.ne.s32.totalorder %s850_s23, 0 }
 0x253   :  { %854 = shalt.err (%p1199_p10)  }
 0x254   :  { %856 = vsyncmov [#allocation3 + $0x6] }
 0x257   :  { %s857_s16 = vpop.sfrf %856 }
 0x258   :  { %p1200_p12 = scmp.ne.s32.totalorder %s857_s16, 0 }
 0x25a   :  { %861 = shalt.err (%p1200_p12)  }
 0x25b   :  { %863 = vsyncmov [#allocation3 + $0x7] }
 0x25e   :  { %s864_s7 = vpop.sfrf %863 }
 0x25f   :  { %p1201_p4 = scmp.ne.s32.totalorder %s864_s7, 0 }
 0x261   :  { %868 = shalt.err (%p1201_p4)  }
 0x262   :  { %870 = vsyncmov [#allocation3 + $0x8] }
 0x265   :  { %s871_s28 = vpop.sfrf %870 }
 0x266   :  { %p1202_p8 = scmp.ne.s32.totalorder %s871_s28, 0 }
 0x268   :  { %875 = shalt.err (%p1202_p8)  }
 0x269   :  { %877 = vsyncmov [#allocation3 + $0x9] }
 0x26c   :  { %s878_s18 = vpop.sfrf %877 }
 0x26d   :  { %p1203_p3 = scmp.ne.s32.totalorder %s878_s18, 0 }
 0x26f   :  { %882 = shalt.err (%p1203_p3)  }
 0x270   :  { %884 = vsyncmov [#allocation3 + $0xa] }
 0x273   :  { %s885_s0 = vpop.sfrf %884 }
 0x274   :  { %p1204_p13 = scmp.ne.s32.totalorder %s885_s0, 0 }
 0x276   :  { %889 = shalt.err (%p1204_p13)  }
 0x277   :  { %891 = vsyncmov [#allocation3 + $0xb] }
 0x27a   :  { %s892_s3 = vpop.sfrf %891 }
 0x27b   :  { %p1205_p7 = scmp.ne.s32.totalorder %s892_s3, 0 }
 0x27d   :  { %896 = shalt.err (%p1205_p7)  }
 0x27e   :  { %898 = vsyncmov [#allocation3 + $0xc] }
 0x281   :  { %s899_s21 = vpop.sfrf %898 }
 0x282   :  { %p1206_p5 = scmp.ne.s32.totalorder %s899_s21, 0 }
 0x284   :  { %903 = shalt.err (%p1206_p5)  }
 0x285   :  { %905 = vsyncmov [#allocation3 + $0xd] }
 0x288   :  { %s906_s25 = vpop.sfrf %905 }
 0x289   :  { %p1207_p0 = scmp.ne.s32.totalorder %s906_s25, 0 }
 0x28b   :  { %910 = shalt.err (%p1207_p0)  }
 0x28c   :  { %912 = vsyncmov [#allocation3 + $0xe] }
 0x28f   :  { %s913_s2 = vpop.sfrf %912 }
 0x290   :  { %p1208_p1 = scmp.ne.s32.totalorder %s913_s2, 0 }
 0x292   :  { %917 = shalt.err (%p1208_p1)  }
 0x293   :  { %919 = vsyncmov [#allocation3 + $0xf] }
 0x296   :  { %s920_s6 = vpop.sfrf %919 }
 0x297   :  { %p1209_p11 = scmp.ne.s32.totalorder %s920_s6, 0 }
 0x299   :  { %924 = shalt.err (%p1209_p11)  }
 0x29a   :  { %926 = vsyncmov [#allocation3 + $0x10] }
 0x29d   :  { %s927_s5 = vpop.sfrf %926 }
 0x29e   :  { %p1210_p2 = scmp.ne.s32.totalorder %s927_s5, 0 }
 0x2a0   :  { %931 = shalt.err (%p1210_p2)  }
 0x2a1   :  { %933 = vsyncmov [#allocation3 + $0x11] }
 0x2a4   :  { %s934_s22 = vpop.sfrf %933 }
 0x2a5   :  { %p1211_p6 = scmp.ne.s32.totalorder %s934_s22, 0 }
 0x2a7   :  { %938 = shalt.err (%p1211_p6)  }
 0x2a8   :  { %940 = vsyncmov [#allocation3 + $0x12] }
 0x2ab   :  { %s941_s26 = vpop.sfrf %940 }
 0x2ac   :  { %p1212_p9 = scmp.ne.s32.totalorder %s941_s26, 0 }
 0x2ae   :  { %945 = shalt.err (%p1212_p9)  }
 0x2af   :  { %947 = vsyncmov [#allocation3 + $0x13] }
 0x2b2   :  { %s948_s8 = vpop.sfrf %947 }
 0x2b3   :  { %p1213_p10 = scmp.ne.s32.totalorder %s948_s8, 0 }
 0x2b5   :  { %952 = shalt.err (%p1213_p10)  }
 0x2b6   :  { %954 = vsyncmov [#allocation3 + $0x14] }
 0x2b9   :  { %s955_s30 = vpop.sfrf %954 }
 0x2ba   :  { %p1214_p12 = scmp.ne.s32.totalorder %s955_s30, 0 }
 0x2bc   :  { %959 = shalt.err (%p1214_p12)  }
 0x2bd   :  { %961 = vsyncmov [#allocation3 + $0x15] }
 0x2c0   :  { %s962_s10 = vpop.sfrf %961 }
 0x2c1   :  { %p1215_p4 = scmp.ne.s32.totalorder %s962_s10, 0 }
 0x2c3   :  { %966 = shalt.err (%p1215_p4)  }
 0x2c4   :  { %968 = vsyncmov [#allocation3 + $0x16] }
 0x2c7   :  { %s969_s24 = vpop.sfrf %968 }
 0x2c8   :  { %p1216_p8 = scmp.ne.s32.totalorder %s969_s24, 0 }
 0x2ca   :  { %973 = shalt.err (%p1216_p8)  }
 0x2cb   :  { %975 = vsyncmov [#allocation3 + $0x17] }
 0x2ce   :  { %s976_s29 = vpop.sfrf %975 }
 0x2cf   :  { %p1217_p3 = scmp.ne.s32.totalorder %s976_s29, 0 }
 0x2d1   :  { %980 = shalt.err (%p1217_p3)  }
 0x2d2   :  { %982 = vsyncmov [#allocation3 + $0x18] }
 0x2d5   :  { %s983_s12 = vpop.sfrf %982 }
 0x2d6   :  { %p1218_p13 = scmp.ne.s32.totalorder %s983_s12, 0 }
 0x2d8   :  { %987 = shalt.err (%p1218_p13)  }
 0x2d9   :  { %989 = vsyncmov [#allocation3 + $0x19] }
 0x2dc   :  { %s990_s13 = vpop.sfrf %989 }
 0x2dd   :  { %p1219_p7 = scmp.ne.s32.totalorder %s990_s13, 0 }
 0x2df   :  { %994 = shalt.err (%p1219_p7)  }
 0x2e0   :  { %996 = vsyncmov [#allocation3 + $0x1a] }
 0x2e3   :  { %s997_s17 = vpop.sfrf %996 }
 0x2e4   :  { %p1220_p5 = scmp.ne.s32.totalorder %s997_s17, 0 }
 0x2e6   :  { %1001 = shalt.err (%p1220_p5)  }
 0x2e7   :  { %1003 = vsyncmov [#allocation3 + $0x1b] }
 0x2ea   :  { %s1004_s19 = vpop.sfrf %1003 }
 0x2eb   :  { %p1221_p0 = scmp.ne.s32.totalorder %s1004_s19, 0 }
 0x2ed   :  { %1008 = shalt.err (%p1221_p0)  }
 0x2ee   :  { %1010 = vsyncmov [#allocation3 + $0x1c] }
 0x2f1   :  { %s1011_s1 = vpop.sfrf %1010 }
 0x2f2   :  { %p1222_p1 = scmp.ne.s32.totalorder %s1011_s1, 0 }
 0x2f4   :  { %1015 = shalt.err (%p1222_p1)  }
 0x2f5   :  { %1017 = vsyncmov [#allocation3 + $0x1d] }
 0x2f8   :  { %s1018_s9 = vpop.sfrf %1017 }
 0x2f9   :  { %p1223_p11 = scmp.ne.s32.totalorder %s1018_s9, 0 }
 0x2fb   :  { %1022 = shalt.err (%p1223_p11)  }
 0x2fc   :  { %1024 = vsyncmov [#allocation3 + $0x1e] }
 0x2ff   :  { %s1025_s15 = vpop.sfrf %1024 }
 0x300   :  { %p1224_p2 = scmp.ne.s32.totalorder %s1025_s15, 0 }
 0x302   :  { %1029 = shalt.err (%p1224_p2)  }
 0x303   :  { %1031 = vsyncmov [#allocation3 + $0x1f] }
 0x306   :  { %s1032_s20 = vpop.sfrf %1031 }
 0x307   :  { %p1225_p6 = scmp.ne.s32.totalorder %s1032_s20, 0 }
 0x309   :  { %1036 = shalt.err (%p1225_p6)  }

</bundles_post_ra>
